<compile_context>
chip_gen: v7x
topology: tpu7x:2x2x1
jax: 0.10.0
libtpu: 0.0.40
codegen_flags: <defaults>
</compile_context>

<pallas_src>
import functools

import jax
import jax.numpy as jnp
from jax.experimental import pallas as pl
from jax.experimental.pallas import tpu as pltpu


OUT_WIDTH = 128      # lane-dense fused head / output width
VALUE_LANE = 125     # value goes here in the fused head
ACTION_LANE = 126    # argmax action (as float) in the output slab
LOGP_LANE = 127      # log-prob of the chosen action in the output slab


# ---------------------------------------------------------------------------
# Deterministic parameter init (mirrors nn.init.orthogonal_ + zero bias).
# ---------------------------------------------------------------------------
def _orthogonal(key, in_dim, out_dim, gain):
    # PyTorch fills a (out, in) matrix with an orthogonal matrix scaled by gain;
    # we return its transpose so the kernel can compute x @ W.
    n_rows, n_cols = out_dim, in_dim
    a = jax.random.normal(key, (max(n_rows, n_cols), min(n_rows, n_cols)), jnp.float32)
    q, r = jnp.linalg.qr(a)
    q = q * jnp.sign(jnp.diagonal(r))
    if n_rows < n_cols:
        q = q.T
    w_torch = gain * q[:n_rows, :n_cols]          # (out, in)
    return jnp.asarray(w_torch.T, jnp.float32)    # (in, out)


def make_policy_params(num_inputs, hidden_size, num_actions, seed=0):
    keys = jax.random.split(jax.random.PRNGKey(seed), 8)
    g_tanh = 5.0 / 3.0
    return {
        # actor: Linear(num_inputs, H) -> Tanh -> Linear(H, H) -> Tanh
        "aw1": _orthogonal(keys[0], num_inputs, hidden_size, g_tanh),
        "ab1": jnp.zeros((1, hidden_size), jnp.float32),
        "aw2": _orthogonal(keys[1], hidden_size, hidden_size, g_tanh),
        "ab2": jnp.zeros((1, hidden_size), jnp.float32),
        # critic: Linear(num_inputs, H) -> Tanh -> Linear(H, H) -> Tanh
        "cw1": _orthogonal(keys[2], num_inputs, hidden_size, g_tanh),
        "cb1": jnp.zeros((1, hidden_size), jnp.float32),
        "cw2": _orthogonal(keys[3], hidden_size, hidden_size, g_tanh),
        "cb2": jnp.zeros((1, hidden_size), jnp.float32),
        # critic_linear: Linear(H, 1), gain 1
        "vw": _orthogonal(keys[4], hidden_size, 1, 1.0),
        "vb": jnp.zeros((1, 1), jnp.float32),
        # dist (Categorical): Linear(H, num_actions), gain 0.01
        "dw": _orthogonal(keys[5], hidden_size, num_actions, 0.01),
        "db": jnp.zeros((1, num_actions), jnp.float32),
    }


def fuse_policy_params(p):
    """Fuse actor/critic/value/dist weights into one 128-lane-wide network.

    Weights are cast to bf16 (native MXU dtype); biases stay f32 (added after
    f32 accumulation).  Zero blocks keep the two branches exactly independent.
    """
    d_in, h = p["aw1"].shape
    na = p["dw"].shape[1]
    hf = 2 * h
    assert na <= VALUE_LANE, "num_actions must leave room for value/action/logp lanes"

    w1 = jnp.concatenate([p["aw1"], p["cw1"]], axis=1)            # (d_in, 2H)
    b1 = jnp.concatenate([p["ab1"], p["cb1"]], axis=1)            # (1, 2H)

    w2 = jnp.zeros((hf, hf), jnp.float32)
    w2 = w2.at[:h, :h].set(p["aw2"]).at[h:, h:].set(p["cw2"])     # block-diag
    b2 = jnp.concatenate([p["ab2"], p["cb2"]], axis=1)            # (1, 2H)

    w3 = jnp.zeros((hf, OUT_WIDTH), jnp.float32)
    w3 = w3.at[:h, :na].set(p["dw"])                              # logits lanes
    w3 = w3.at[h:, VALUE_LANE:VALUE_LANE + 1].set(p["vw"])        # value lane
    b3 = jnp.zeros((1, OUT_WIDTH), jnp.float32)
    b3 = b3.at[:, :na].set(p["db"]).at[:, VALUE_LANE:VALUE_LANE + 1].set(p["vb"])

    return {
        "w1": w1.astype(jnp.bfloat16), "b1": b1,
        "w2": w2.astype(jnp.bfloat16), "b2": b2,
        "w3": w3.astype(jnp.bfloat16), "b3": b3,
    }


# ---------------------------------------------------------------------------
# Pallas kernel: fused Policy.act(deterministic=True) for one batch tile.
# ---------------------------------------------------------------------------
def _policy_fused_kernel(x_ref, w1_ref, b1_ref, w2_ref, b2_ref, w3_ref, b3_ref,
                         out_ref, *, num_actions, value_lane, action_lane,
                         logp_lane):
    x = x_ref[...]                                                # (TB, D_in) f32

    # 3 full-width MXU matmuls; bf16 operands, f32 accumulation, f32 tanh.
    h1 = jnp.tanh(
        jnp.dot(x.astype(jnp.bfloat16), w1_ref[...],
                preferred_element_type=jnp.float32) + b1_ref[...])
    h2 = jnp.tanh(
        jnp.dot(h1.astype(jnp.bfloat16), w2_ref[...],
                preferred_element_type=jnp.float32) + b2_ref[...])
    head = jnp.dot(h2.astype(jnp.bfloat16), w3_ref[...],
                   preferred_element_type=jnp.float32) + b3_ref[...]
    # head lanes: [0, NA) = dist logits, VALUE_LANE = value, others exactly 0.

    lane = jax.lax.broadcasted_iota(jnp.int32, head.shape, 1)     # (TB, 128)

    # Masked softmax / log-softmax over the full 128-lane vreg.
    logits = jnp.where(lane < num_actions, head, -jnp.inf)
    m = jnp.max(logits, axis=-1, keepdims=True)
    e = jnp.exp(logits - m)                                       # 0 on padded lanes
    s = jnp.sum(e, axis=-1, keepdims=True)
    probs = e * pl.reciprocal(s, approx=True)                     # EUP vrcp slot

    # dist.mode(): first-max argmax (matches torch.argmax).
    action = jnp.min(jnp.where(logits == m, lane, jnp.int32(head.shape[-1])),
                     axis=-1, keepdims=True)                      # (TB, 1) int32

    # dist.log_probs(action): gather via select (avoids -inf * 0 NaNs).
    log_probs_sel = jnp.where(lane == action, (logits - m) - jnp.log(s), 0.0)
    logp = jnp.sum(log_probs_sel, axis=-1, keepdims=True)         # (TB, 1)

    # Lane-dense (TB, 128) output slab: probs | ... | value | action | logp.
    out = jnp.where(lane < num_actions, probs, head)              # head holds value
    out = jnp.where(lane == action_lane, action.astype(jnp.float32), out)
    out = jnp.where(lane == logp_lane, logp, out)
    out_ref[...] = out


@functools.partial(jax.jit, static_argnames=("num_actions", "tb"))
def policy_act(x, rnn_hxs, masks, fused_params, *, num_actions, tb=128):
    """Equivalent of Policy.act(inputs, rnn_hxs, masks, deterministic=True)."""
    del masks  # non-recurrent MLPBase: masks only feed the (absent) GRU
    batch, d_in = x.shape
    hf = fused_params["w1"].shape[1]

    # Batch tiling: pad to a multiple of the tile (>= 8 sublanes).
    tb_eff = min(tb, ((batch + 7) // 8) * 8)
    b_pad = ((batch + tb_eff - 1) // tb_eff) * tb_eff
    if b_pad != batch:
        x = jnp.pad(x, ((0, b_pad - batch), (0, 0)))
    grid = (b_pad // tb_eff,)

    kernel = functools.partial(
        _policy_fused_kernel, num_actions=num_actions,
        value_lane=VALUE_LANE, action_lane=ACTION_LANE, logp_lane=LOGP_LANE)

    cost = pl.CostEstimate(
        flops=2 * b_pad * (d_in * hf + hf * hf + hf * OUT_WIDTH),
        transcendentals=b_pad * (2 * hf + OUT_WIDTH),
        bytes_accessed=(4 * b_pad * (d_in + OUT_WIDTH)
                        + 2 * (d_in * hf + hf * hf + hf * OUT_WIDTH)
                        + 4 * (2 * hf + OUT_WIDTH)),
    )

    out = pl.pallas_call(
        kernel,
        out_shape=jax.ShapeDtypeStruct((b_pad, OUT_WIDTH), jnp.float32),
        grid=grid,
        in_specs=[
            pl.BlockSpec((tb_eff, d_in), lambda i: (i, 0)),        # x (tiled)
            pl.BlockSpec((d_in, hf), lambda i: (0, 0)),            # w1 (resident)
            pl.BlockSpec((1, hf), lambda i: (0, 0)),               # b1
            pl.BlockSpec((hf, hf), lambda i: (0, 0)),              # w2
            pl.BlockSpec((1, hf), lambda i: (0, 0)),               # b2
            pl.BlockSpec((hf, OUT_WIDTH), lambda i: (0, 0)),       # w3
            pl.BlockSpec((1, OUT_WIDTH), lambda i: (0, 0)),        # b3
        ],
        out_specs=pl.BlockSpec((tb_eff, OUT_WIDTH), lambda i: (i, 0)),
        compiler_params=pltpu.CompilerParams(
            dimension_semantics=("parallel",)),
        cost_estimate=cost,
    )(x, fused_params["w1"], fused_params["b1"],
      fused_params["w2"], fused_params["b2"],
      fused_params["w3"], fused_params["b3"])

    out = out[:batch]
    probs = out[:, :num_actions]
    value = out[:, VALUE_LANE:VALUE_LANE + 1]
    action = out[:, ACTION_LANE:ACTION_LANE + 1].astype(jnp.int32)
    logp = out[:, LOGP_LANE:LOGP_LANE + 1]

    # rnn_hxs pass through unchanged (base is not recurrent).
    return value, action, logp, probs, rnn_hxs


# ---------------------------------------------------------------------------
# Pure-JAX reference doing the same math (bf16 weights / matmul operands,
# f32 accumulation) for a tight correctness check.
# ---------------------------------------------------------------------------
def policy_act_ref(x, fp, num_actions):
    h1 = jnp.tanh(jnp.dot(x.astype(jnp.bfloat16), fp["w1"],
                          preferred_element_type=jnp.float32) + fp["b1"])
    h2 = jnp.tanh(jnp.dot(h1.astype(jnp.bfloat16), fp["w2"],
                          preferred_element_type=jnp.float32) + fp["b2"])
    head = jnp.dot(h2.astype(jnp.bfloat16), fp["w3"],
                   preferred_element_type=jnp.float32) + fp["b3"]
    logits = head[:, :num_actions]
    value = head[:, VALUE_LANE:VALUE_LANE + 1]
    probs = jax.nn.softmax(logits, axis=-1)
    logsm = jax.nn.log_softmax(logits, axis=-1)
    action = jnp.argmax(logits, axis=-1, keepdims=True).astype(jnp.int32)
    logp = jnp.take_along_axis(logsm, action, axis=-1)
    return value, action, logp, probs


if __name__ == "__main__":
    BATCH = 256          # exercises a 2-step batch grid with TB=128
    NUM_INPUTS = 32      # obs_shape = (32,)  -> MLPBase
    HIDDEN = 64          # MLPBase default hidden_size
    NUM_ACTIONS = 6      # Discrete(6) action space -> Categorical head

    key = jax.random.PRNGKey(0)
    k_x, _ = jax.random.split(key)
    x = jax.random.normal(k_x, (BATCH, NUM_INPUTS), jnp.float32)
    rnn_hxs = jnp.zeros((BATCH, 1), jnp.float32)   # recurrent_hidden_state_size == 1
    masks = jnp.ones((BATCH, 1), jnp.float32)

    raw_params = make_policy_params(NUM_INPUTS, HIDDEN, NUM_ACTIONS, seed=0)
    fused_params = fuse_policy_params(raw_params)

    value, action, logp, probs, rnn_hxs_out = policy_act(
        x, rnn_hxs, masks, fused_params, num_actions=NUM_ACTIONS, tb=128)
    jax.block_until_ready((value, action, logp, probs, rnn_hxs_out))

    # Correctness check against the same-math pure-JAX reference.
    v_r, a_r, lp_r, p_r = policy_act_ref(x, fused_params, NUM_ACTIONS)
    assert value.shape == (BATCH, 1) and action.shape == (BATCH, 1)
    assert logp.shape == (BATCH, 1) and probs.shape == (BATCH, NUM_ACTIONS)
    assert jnp.allclose(value, v_r, atol=1e-4), "value mismatch"
    assert jnp.array_equal(action, a_r), "action mismatch"
    assert jnp.allclose(logp, lp_r, atol=1e-4), "log_prob mismatch"
    # probs tolerance accounts for the EUP approximate reciprocal (~2^-12 rel).
    assert jnp.allclose(probs, p_r, atol=2e-3), "probs mismatch"

    print("KERNEL_OK")
</pallas_src>

<mosaic_0001>
module attributes {stable_mosaic.version = 11 : i64} {
  func.func @_policy_fused_kernel(%arg0: i32, %arg1: memref<128x32xf32, #tpu.memory_space<vmem>>, %arg2: memref<32x128xbf16, #tpu.memory_space<vmem>>, %arg3: memref<1x128xf32, #tpu.memory_space<vmem>>, %arg4: memref<128x128xbf16, #tpu.memory_space<vmem>>, %arg5: memref<1x128xf32, #tpu.memory_space<vmem>>, %arg6: memref<128x128xbf16, #tpu.memory_space<vmem>>, %arg7: memref<1x128xf32, #tpu.memory_space<vmem>>, %arg8: memref<128x128xf32, #tpu.memory_space<vmem>>) attributes {dimension_semantics = [#tpu.dimension_semantics<parallel>], iteration_bounds = array<i64: 2>, scalar_prefetch = 0 : i64, scratch_operands = 0 : i64, tpu.core_type = #tpu.core_type<tc>, window_params = [{transform_indices = @transform_0, window_bounds = array<i64: 128, 32>}, {pipeline_mode = #tpu.pipeline_mode<synchronous>, transform_indices = @transform_1, window_bounds = array<i64: 32, 128>}, {pipeline_mode = #tpu.pipeline_mode<synchronous>, transform_indices = @transform_2, window_bounds = array<i64: 1, 128>}, {pipeline_mode = #tpu.pipeline_mode<synchronous>, transform_indices = @transform_3, window_bounds = array<i64: 128, 128>}, {pipeline_mode = #tpu.pipeline_mode<synchronous>, transform_indices = @transform_4, window_bounds = array<i64: 1, 128>}, {pipeline_mode = #tpu.pipeline_mode<synchronous>, transform_indices = @transform_5, window_bounds = array<i64: 128, 128>}, {pipeline_mode = #tpu.pipeline_mode<synchronous>, transform_indices = @transform_6, window_bounds = array<i64: 1, 128>}, {transform_indices = @transform_7, window_bounds = array<i64: 128, 128>}]} {
    %c0 = arith.constant 0 : index
    %c0_0 = arith.constant 0 : index
    %0 = vector.load %arg1[%c0, %c0_0] : memref<128x32xf32, #tpu.memory_space<vmem>>, vector<128x32xf32>
    %1 = arith.truncf %0 : vector<128x32xf32> to vector<128x32xbf16>
    %c0_1 = arith.constant 0 : index
    %c0_2 = arith.constant 0 : index
    %2 = vector.load %arg2[%c0_1, %c0_2] : memref<32x128xbf16, #tpu.memory_space<vmem>>, vector<32x128xbf16>
    %cst = arith.constant dense<0.000000e+00> : vector<128x128xf32>
    %3 = tpu.matmul %1, %2, %cst {dimension_numbers = #tpu.dot_dimension_numbers<[1], [0], [0], [1], [0, 0, 1, 1], [], []>} : vector<128x32xbf16>, vector<32x128xbf16>, vector<128x128xf32> -> vector<128x128xf32>
    %c0_3 = arith.constant 0 : index
    %c0_4 = arith.constant 0 : index
    %4 = vector.load %arg3[%c0_3, %c0_4] : memref<1x128xf32, #tpu.memory_space<vmem>>, vector<1x128xf32>
    %5 = vector.broadcast %4 : vector<1x128xf32> to vector<128x128xf32>
    %6 = arith.addf %3, %5 : vector<128x128xf32>
    %7 = math.tanh %6 : vector<128x128xf32>
    %8 = arith.truncf %7 : vector<128x128xf32> to vector<128x128xbf16>
    %c0_5 = arith.constant 0 : index
    %c0_6 = arith.constant 0 : index
    %9 = vector.load %arg4[%c0_5, %c0_6] : memref<128x128xbf16, #tpu.memory_space<vmem>>, vector<128x128xbf16>
    %cst_7 = arith.constant dense<0.000000e+00> : vector<128x128xf32>
    %10 = tpu.matmul %8, %9, %cst_7 {dimension_numbers = #tpu.dot_dimension_numbers<[1], [0], [0], [1], [0, 0, 1, 1], [], []>} : vector<128x128xbf16>, vector<128x128xbf16>, vector<128x128xf32> -> vector<128x128xf32>
    %c0_8 = arith.constant 0 : index
    %c0_9 = arith.constant 0 : index
    %11 = vector.load %arg5[%c0_8, %c0_9] : memref<1x128xf32, #tpu.memory_space<vmem>>, vector<1x128xf32>
    %12 = vector.broadcast %11 : vector<1x128xf32> to vector<128x128xf32>
    %13 = arith.addf %10, %12 : vector<128x128xf32>
    %14 = math.tanh %13 : vector<128x128xf32>
    %15 = arith.truncf %14 : vector<128x128xf32> to vector<128x128xbf16>
    %c0_10 = arith.constant 0 : index
    %c0_11 = arith.constant 0 : index
    %16 = vector.load %arg6[%c0_10, %c0_11] : memref<128x128xbf16, #tpu.memory_space<vmem>>, vector<128x128xbf16>
    %cst_12 = arith.constant dense<0.000000e+00> : vector<128x128xf32>
    %17 = tpu.matmul %15, %16, %cst_12 {dimension_numbers = #tpu.dot_dimension_numbers<[1], [0], [0], [1], [0, 0, 1, 1], [], []>} : vector<128x128xbf16>, vector<128x128xbf16>, vector<128x128xf32> -> vector<128x128xf32>
    %c0_13 = arith.constant 0 : index
    %c0_14 = arith.constant 0 : index
    %18 = vector.load %arg7[%c0_13, %c0_14] : memref<1x128xf32, #tpu.memory_space<vmem>>, vector<1x128xf32>
    %19 = vector.broadcast %18 : vector<1x128xf32> to vector<128x128xf32>
    %20 = arith.addf %17, %19 : vector<128x128xf32>
    %21 = tpu.iota {dimensions = array<i32: 1>} : vector<128x128xi32>
    %c6_i32 = arith.constant 6 : i32
    %22 = vector.broadcast %c6_i32 : i32 to vector<128x128xi32>
    %23 = arith.cmpi slt, %21, %22 : vector<128x128xi32>
    %cst_15 = arith.constant 0xFF800000 : f32
    %24 = vector.broadcast %cst_15 : f32 to vector<128x128xf32>
    %25 = arith.select %23, %20, %24 : vector<128x128xi1>, vector<128x128xf32>
    %cst_16 = arith.constant dense<0xFF800000> : vector<128xf32>
    %26 = vector.multi_reduction <maximumf>, %25, %cst_16 [1] : vector<128x128xf32> to vector<128xf32>
    %27 = vector.shape_cast %26 : vector<128xf32> to vector<128x1xf32>
    %28 = vector.broadcast %27 : vector<128x1xf32> to vector<128x128xf32>
    %29 = arith.subf %25, %28 : vector<128x128xf32>
    %30 = math.exp %29 : vector<128x128xf32>
    %cst_17 = arith.constant dense<0.000000e+00> : vector<128xf32>
    %31 = vector.multi_reduction <add>, %30, %cst_17 [1] : vector<128x128xf32> to vector<128xf32>
    %32 = vector.shape_cast %31 : vector<128xf32> to vector<128x1xf32>
    %33 = tpu.reciprocal %32 {approx = true} : vector<128x1xf32> -> vector<128x1xf32>
    %34 = vector.broadcast %33 : vector<128x1xf32> to vector<128x128xf32>
    %35 = arith.mulf %30, %34 : vector<128x128xf32>
    %36 = vector.broadcast %27 : vector<128x1xf32> to vector<128x128xf32>
    %37 = arith.cmpf oeq, %25, %36 : vector<128x128xf32>
    %c128_i32 = arith.constant 128 : i32
    %38 = vector.broadcast %c128_i32 : i32 to vector<128x128xi32>
    %39 = arith.select %37, %21, %38 : vector<128x128xi1>, vector<128x128xi32>
    %cst_18 = arith.constant dense<2147483647> : vector<128xi32>
    %40 = vector.multi_reduction <minsi>, %39, %cst_18 [1] : vector<128x128xi32> to vector<128xi32>
    %41 = vector.shape_cast %40 : vector<128xi32> to vector<128x1xi32>
    %42 = vector.broadcast %41 : vector<128x1xi32> to vector<128x128xi32>
    %43 = arith.cmpi eq, %21, %42 : vector<128x128xi32>
    %44 = vector.broadcast %27 : vector<128x1xf32> to vector<128x128xf32>
    %45 = arith.subf %25, %44 : vector<128x128xf32>
    %46 = math.log %32 : vector<128x1xf32>
    %47 = vector.broadcast %46 : vector<128x1xf32> to vector<128x128xf32>
    %48 = arith.subf %45, %47 : vector<128x128xf32>
    %cst_19 = arith.constant 0.000000e+00 : f32
    %49 = vector.broadcast %cst_19 : f32 to vector<128x128xf32>
    %50 = arith.select %43, %48, %49 : vector<128x128xi1>, vector<128x128xf32>
    %cst_20 = arith.constant dense<0.000000e+00> : vector<128xf32>
    %51 = vector.multi_reduction <add>, %50, %cst_20 [1] : vector<128x128xf32> to vector<128xf32>
    %52 = vector.shape_cast %51 : vector<128xf32> to vector<128x1xf32>
    %c6_i32_21 = arith.constant 6 : i32
    %53 = vector.broadcast %c6_i32_21 : i32 to vector<128x128xi32>
    %54 = arith.cmpi slt, %21, %53 : vector<128x128xi32>
    %55 = arith.select %54, %35, %20 : vector<128x128xi1>, vector<128x128xf32>
    %c126_i32 = arith.constant 126 : i32
    %56 = vector.broadcast %c126_i32 : i32 to vector<128x128xi32>
    %57 = arith.cmpi eq, %21, %56 : vector<128x128xi32>
    %58 = arith.sitofp %41 : vector<128x1xi32> to vector<128x1xf32>
    %59 = vector.shape_cast %58 : vector<128x1xf32> to vector<128x1xf32>
    %60 = vector.broadcast %59 : vector<128x1xf32> to vector<128x128xf32>
    %61 = arith.select %57, %60, %55 : vector<128x128xi1>, vector<128x128xf32>
    %c127_i32 = arith.constant 127 : i32
    %62 = vector.broadcast %c127_i32 : i32 to vector<128x128xi32>
    %63 = arith.cmpi eq, %21, %62 : vector<128x128xi32>
    %64 = vector.shape_cast %52 : vector<128x1xf32> to vector<128x1xf32>
    %65 = vector.broadcast %64 : vector<128x1xf32> to vector<128x128xf32>
    %66 = arith.select %63, %65, %61 : vector<128x128xi1>, vector<128x128xf32>
    %c0_22 = arith.constant 0 : index
    %c0_23 = arith.constant 0 : index
    %67 = vector.load %arg8[%c0_22, %c0_23] : memref<128x128xf32, #tpu.memory_space<vmem>>, vector<128x128xf32>
    tpu.vector_store %arg8[%c0_22, %c0_23], %66 {strides = array<i32>} : memref<128x128xf32, #tpu.memory_space<vmem>>, vector<128x128xf32>,
    return
  }
  func.func @transform_0(%arg0: i32) -> (i32, i32) {
    %c0_i32 = arith.constant 0 : i32
    %c0_i32_0 = arith.constant 0 : i32
    return %arg0, %c0_i32 : i32, i32
  }
  func.func @transform_1(%arg0: i32) -> (i32, i32) {
    %c0_i32 = arith.constant 0 : i32
    %c0_i32_0 = arith.constant 0 : i32
    %c0_i32_1 = arith.constant 0 : i32
    return %c0_i32, %c0_i32_0 : i32, i32
  }
  func.func @transform_2(%arg0: i32) -> (i32, i32) {
    %c0_i32 = arith.constant 0 : i32
    %c0_i32_0 = arith.constant 0 : i32
    %c0_i32_1 = arith.constant 0 : i32
    return %c0_i32, %c0_i32_0 : i32, i32
  }
  func.func @transform_3(%arg0: i32) -> (i32, i32) {
    %c0_i32 = arith.constant 0 : i32
    %c0_i32_0 = arith.constant 0 : i32
    %c0_i32_1 = arith.constant 0 : i32
    return %c0_i32, %c0_i32_0 : i32, i32
  }
  func.func @transform_4(%arg0: i32) -> (i32, i32) {
    %c0_i32 = arith.constant 0 : i32
    %c0_i32_0 = arith.constant 0 : i32
    %c0_i32_1 = arith.constant 0 : i32
    return %c0_i32, %c0_i32_0 : i32, i32
  }
  func.func @transform_5(%arg0: i32) -> (i32, i32) {
    %c0_i32 = arith.constant 0 : i32
    %c0_i32_0 = arith.constant 0 : i32
    %c0_i32_1 = arith.constant 0 : i32
    return %c0_i32, %c0_i32_0 : i32, i32
  }
  func.func @transform_6(%arg0: i32) -> (i32, i32) {
    %c0_i32 = arith.constant 0 : i32
    %c0_i32_0 = arith.constant 0 : i32
    %c0_i32_1 = arith.constant 0 : i32
    return %c0_i32, %c0_i32_0 : i32, i32
  }
  func.func @transform_7(%arg0: i32) -> (i32, i32) {
    %c0_i32 = arith.constant 0 : i32
    %c0_i32_0 = arith.constant 0 : i32
    return %arg0, %c0_i32 : i32, i32
  }
}

</mosaic_0001>

<bundles_post_ra>
// kernel: policy_act.1
= control target key start
LH: loop header
LB: loop body
LE: loop exit
PB: predicated region body
PF: predicated region fallthrough
CT: control target
= control target key end

     0   :  { %s1905_s24 = smov 0   ;;  %s2898_s0 = inlined_call_operand.vmem [shape: f32[256,32], index: 0, kind: input, shape index: {}]   ;;  %s2899_s1 = inlined_call_operand.vmem [shape: bf16[32,128], index: 1, kind: input, shape index: {}]   ;;  %s2900_s2 = inlined_call_operand.vmem [shape: f32[1,128], index: 2, kind: input, shape index: {}]   ;;  %s2901_s3 = inlined_call_operand.vmem [shape: bf16[128,128], index: 3, kind: input, shape index: {}]   ;;  %s2902_s4 = inlined_call_operand.vmem [shape: f32[1,128], index: 4, kind: input, shape index: {}]   ;;  %s2903_s5 = inlined_call_operand.vmem [shape: bf16[128,128], index: 5, kind: input, shape index: {}]   ;;  %s2904_s6 = inlined_call_operand.vmem [shape: f32[1,128], index: 6, kind: input, shape index: {}]   ;;  %s2905_s7 = inlined_call_operand.vmem [shape: f32[256,128], index: 7, kind: output, shape index: {}]  }
   0x1 LB: > { %s1505_s25 = sadd.s32 4294967295, %s1863_s24   ;;  %p1509_p0 = scmp.ge.s32.totalorder %s1863_s24, 1  ;;  %s1863_s24 = sphi %s1905_s24, %s17_s24  }
   0x2   : > { %p238_p1 = scmp.lt.s32.totalorder %s1863_s24, 3 }
   0x4   : > { %p239_p2 = pnand %p1509_p0, %p238_p1 }
   0x6   : > { %242 = sbr.rel (%p239_p2) target bundleno = 1316 (0x524), region = 48 }
   0xd   : > { %v1679_v0 = vld [vmem:[%s2899_s1] sm:$0xff]   ;;  %s1510_s28 = sshll.u32 %s1505_s25, 4  ;;  %v1680_v1 = vld [vmem:[%s2899_s1 + $0x8] sm:$0xff]   ;;  %v1683_v4 = vld [vmem:[%s2901_s3 + $0x10] sm:$0xff]   ;;  %vm330_vm0 = vcmask 261120  }
   0xe   : > { %p271_p3 = scmp.lt.s32.totalorder %s1510_s28, 31  ;;  %1587 = vmatprep.subr.bf16.mxu0 %v1679_v0  ;;  %v1681_v2 = vld [vmem:[%s2901_s3] sm:$0xff]   ;;  %v1682_v3 = vld [vmem:[%s2901_s3 + $0x8] sm:$0xff]   ;;  %v1684_v29 = vld [vmem:[%s2901_s3 + $0x18] sm:$0xff]  }
   0xf   : > { %1588 = vmatpush3.bf16.msra.mxu0 %v1679_v0  ;;  %1607 = vmatprep.subr.bf16.mxu1 %v1681_v2  ;;  %v1685_v30 = vld [vmem:[%s2901_s3 + $0x20] sm:$0xff]   ;;  %v1686_v31 = vld [vmem:[%s2901_s3 + $0x28] sm:$0xff]   ;;  %v1687_v32 = vld [vmem:[%s2901_s3 + $0x30] sm:$0xff]  }
  0x10   : > { %s2995_s28 = smov (!%p271_p3, %s1510_s28), 31  ;;  %1589 = vmatprep.subr.bf16.mxu0 %v1680_v1  ;;  %1608 = vmatpush3.bf16.msra.mxu1 %v1681_v2  ;;  %v1688_v33 = vld [vmem:[%s2901_s3 + $0x38] sm:$0xff]   ;;  %v1689_v34 = vld [vmem:[%s2903_s5] sm:$0xff]   ;;  %v1690_v35 = vld [vmem:[%s2903_s5 + $0x8] sm:$0xff]  }
  0x11   : > { %s1511_s12 = sshll.u32 %s2995_s28, 3  ;;  %1609 = vmatprep.subr.bf16.mxu1 %v1682_v3  ;;  %v1691_v36 = vld [vmem:[%s2903_s5 + $0x10] sm:$0xff]   ;;  %v1692_v37 = vld [vmem:[%s2903_s5 + $0x18] sm:$0xff]   ;;  %v1514_v38 = vld [vmem:[%s2900_s2] ss:$0 sm:$0xff] }
  0x12   : > { %s1936_s17 = scalar_lea.vmem %s2898_s0, %s1511_s12  ;;  %s2816_s11 = scalar_lea.vmem %s2905_s7, %s1511_s12 }
  0x13   : > { %1590 = vmatpush3.bf16.msra.mxu0 %v1680_v1  ;;  %v283_v5 = vld [vmem:[%s1936_s17] sm:$0xff]  ;;  %v284_v6 = vld [vmem:[%s1936_s17 + $0x8] sm:$0xff]  ;;  %v285_v7 = vld [vmem:[%s1936_s17 + $0x10] sm:$0xff] }
  0x14   : > { %v299_v8 = vpack.c.bf16 %v284_v6, %v283_v5  ;;  %v286_v9 = vld [vmem:[%s1936_s17 + $0x18] sm:$0xff]  ;;  %v287_v10 = vld [vmem:[%s1936_s17 + $0x20] sm:$0xff]  ;;  %v288_v11 = vld [vmem:[%s1936_s17 + $0x28] sm:$0xff]  ;;  %1610 = vmatpush3.bf16.msra.mxu1 %v1682_v3  ;;  %1639 = vmatprep.subr.bf16.mxu0 %v1689_v34 }
  0x15   : > { %v300_v12 = vpack.c.bf16 %v286_v9, %v285_v7  ;;  %v301_v13 = vpack.c.bf16 %v288_v11, %v287_v10  ;;  %1611 = vmatprep.subr.bf16.mxu1 %v1683_v4  ;;  %v289_v14 = vld [vmem:[%s1936_s17 + $0x30] sm:$0xff]  ;;  %v290_v15 = vld [vmem:[%s1936_s17 + $0x38] sm:$0xff]  ;;  %v291_v16 = vld [vmem:[%s1936_s17 + $0x40] sm:$0xff] }
  0x16   : > { %1591 = vmatprep.mubr.msk.bf16.mxu0 %vm330_vm0, %v299_v8  ;;  %v292_v17 = vld [vmem:[%s1936_s17 + $0x48] sm:$0xff]  ;;  %v302_v18 = vpack.c.bf16 %v290_v15, %v289_v14  ;;  %v293_v20 = vld [vmem:[%s1936_s17 + $0x50] sm:$0xff]  ;;  %v294_v21 = vld [vmem:[%s1936_s17 + $0x58] sm:$0xff] }
  0x17   : > { %1592 = vmatmul.mubr.msk.bf16.vlgmr.msra.gmra.mrb[0].mxu0 %vm330_vm0, %v300_v12  ;;  %v303_v19 = vpack.c.bf16 %v292_v17, %v291_v16  ;;  %v295_v22 = vld [vmem:[%s1936_s17 + $0x60] sm:$0xff]  ;;  %v296_v23 = vld [vmem:[%s1936_s17 + $0x68] sm:$0xff]  ;;  %v304_v24 = vpack.c.bf16 %v294_v21, %v293_v20  ;;  %v297_v26 = vld [vmem:[%s1936_s17 + $0x70] sm:$0xff] }
  0x18   : > { %1595 = vmatprep.mubr.msk.bf16.mxu0 %vm330_vm0, %v301_v13  ;;  %1612 = vmatpush3.bf16.msra.mxu1 %v1683_v4  ;;  %v305_v25 = vpack.c.bf16 %v296_v23, %v295_v22  ;;  %v298_v27 = vld [vmem:[%s1936_s17 + $0x78] sm:$0xff] }
  0x19   : > { %v306_v28 = vpack.c.bf16 %v298_v27, %v297_v26  ;;  %1613 = vmatprep.subr.bf16.mxu1 %v1684_v29  ;;  %1640 = vmatpush3.bf16.msra.mxu0 %v1689_v34  ;;  %v1696_v34 = vld [vmem:[%s2903_s5 + $0x38] sm:$0xff]  }
  0x1a   : > { %1641 = vmatprep.subr.bf16.mxu0 %v1690_v35 }
  0x1c   : > { %1614 = vmatpush3.bf16.msra.mxu1 %v1684_v29 }
  0x1d   : > { %1615 = vmatprep.subr.bf16.mxu1 %v1685_v30  ;;  %1642 = vmatpush3.bf16.msra.mxu0 %v1690_v35  ;;  %v1525_v35 = vld [vmem:[%s2902_s4] ss:$0 sm:$0xff] }
  0x1e   : > { %1643 = vmatprep.subr.bf16.mxu0 %v1691_v36 }
  0x1f   : > { %1596 = vmatmul.mubr.msk.bf16.gmra.mrb[4].mxu0 %vm330_vm0, %v302_v18 }
  0x20   : > { %1599 = vmatprep.mubr.msk.bf16.mxu0 %vm330_vm0, %v303_v19  ;;  %1616 = vmatpush3.bf16.msra.mxu1 %v1685_v30 }
  0x21   : > { %1617 = vmatprep.subr.bf16.mxu1 %v1686_v31  ;;  %1644 = vmatpush3.bf16.msra.mxu0 %v1691_v36 }
  0x22   : > { %1645 = vmatprep.subr.bf16.mxu0 %v1692_v37 }
  0x24   : > { %1618 = vmatpush3.bf16.msra.mxu1 %v1686_v31  ;;  %v1693_v31 = vld [vmem:[%s2903_s5 + $0x20] sm:$0xff]  }
  0x25   : > { %1619 = vmatprep.subr.bf16.mxu1 %v1687_v32  ;;  %1646 = vmatpush3.bf16.msra.mxu0 %v1692_v37 }
  0x26   : > { %1647 = vmatprep.subr.bf16.mxu0 %v1693_v31 }
  0x27   : > { %1600 = vmatmul.mubr.msk.bf16.gmra.mrb[8].mxu0 %vm330_vm0, %v304_v24 }
  0x28   : > { %1603 = vmatprep.mubr.msk.bf16.mxu0 %vm330_vm0, %v305_v25  ;;  %1620 = vmatpush3.bf16.msra.mxu1 %v1687_v32  ;;  %v1694_v32 = vld [vmem:[%s2903_s5 + $0x28] sm:$0xff]  }
  0x29   : > { %1621 = vmatprep.subr.bf16.mxu1 %v1688_v33  ;;  %1648 = vmatpush3.bf16.msra.mxu0 %v1693_v31 }
  0x2a   : > { %1649 = vmatprep.subr.bf16.mxu0 %v1694_v32 }
  0x2c   : > { %1622 = vmatpush3.bf16.msra.mxu1 %v1688_v33  ;;  %v1695_v33 = vld [vmem:[%s2903_s5 + $0x30] sm:$0xff]  }
  0x2d   : > { %1650 = vmatpush3.bf16.msra.mxu0 %v1694_v32 }
  0x2e   : > { %1651 = vmatprep.subr.bf16.mxu0 %v1695_v33 }
  0x2f   : > { %1604 = vmatmul.mubr.msk.bf16.gmra.mrb[12].mxu0 %vm330_vm0, %v306_v28 }
  0x31   : > { %1652 = vmatpush3.bf16.msra.mxu0 %v1695_v33 }
  0x32   : > { %1653 = vmatprep.subr.bf16.mxu0 %v1696_v34 }
  0x35   : > { %1654 = vmatpush3.bf16.msra.mxu0 %v1696_v34 }
  0xea   : > { %v1593_v39 = vpop.f32.mrb[0].mxu0 }
  0xeb   : > { %v398_v40 = vadd.f32 %v1593_v39, %v1514_v38  ;;  %v389_v41 = vpop.f32.mrb[1].mxu0 }
  0xec   : > { %v390_v42 = vadd.f32 %v1514_v38, %v389_v41  ;;  %v1594_v43 = vpop.f32.mrb[2].mxu0 }
  0xed   : > { %1697 = vtanh.f32 %v398_v40  ;;  %v401_v44 = vadd.f32 %v1594_v43, %v1514_v38  ;;  %v392_v45 = vpop.f32.mrb[3].mxu0 }
  0xee   : > { %1699 = vtanh.f32 %v390_v42  ;;  %v393_v46 = vadd.f32 %v1514_v38, %v392_v45 }
  0xef   : > { %1701 = vtanh.f32 %v401_v44 }
  0xf0   : > { %1703 = vtanh.f32 %v393_v46 }
  0xf2   : > { %v1597_v47 = vpop.f32.mrb[4].mxu0 }
  0xf3   : > { %v414_v48 = vadd.f32 %v1597_v47, %v1514_v38  ;;  %v405_v49 = vpop.f32.mrb[5].mxu0 }
  0xf4   : > { %v406_v50 = vadd.f32 %v1514_v38, %v405_v49  ;;  %v1598_v51 = vpop.f32.mrb[6].mxu0 }
  0xf5   : > { %1705 = vtanh.f32 %v414_v48  ;;  %v417_v52 = vadd.f32 %v1598_v51, %v1514_v38  ;;  %v408_v53 = vpop.f32.mrb[7].mxu0 }
  0xf6   : > { %1707 = vtanh.f32 %v406_v50  ;;  %v409_v54 = vadd.f32 %v1514_v38, %v408_v53 }
  0xf7   : > { %v1698_v55 = vpop.eup %1697  ;;  %1709 = vtanh.f32 %v417_v52 }
  0xf8   : > { %v1700_v56 = vpop.eup %1699  ;;  %1711 = vtanh.f32 %v409_v54 }
  0xf9   : > { %v1702_v57 = vpop.eup %1701 }
  0xfa   : > { %v1704_v58 = vpop.eup %1703  ;;  %v1601_v59 = vpop.f32.mrb[8].mxu0  ;;  %v469_v60 = vpack.c.bf16 %v1702_v57, %v1698_v55 }
  0xfb   : > { %v430_v61 = vadd.f32 %v1601_v59, %v1514_v38  ;;  %v421_v62 = vpop.f32.mrb[9].mxu0  ;;  %v468_v63 = vpack.c.bf16 %v1704_v58, %v1700_v56 }
  0xfc   : > { %v422_v0 = vadd.f32 %v1514_v38, %v421_v62  ;;  %v1602_v1 = vpop.f32.mrb[10].mxu0 }
  0xfd   : > { %1713 = vtanh.f32 %v430_v61  ;;  %v433_v2 = vadd.f32 %v1602_v1, %v1514_v38  ;;  %v424_v3 = vpop.f32.mrb[11].mxu0  ;;  %1623 = vmatprep.mubr.bf16.mxu1 %v468_v63 }
  0xfe   : > { %1715 = vtanh.f32 %v422_v0  ;;  %v425_v4 = vadd.f32 %v1514_v38, %v424_v3  ;;  %1624 = vmatmul.mubr.bf16.vlgmr.msra.gmra.mrb[0].mxu1 %v469_v60 }
  0xff   : > { %v1706_v5 = vpop.eup %1705  ;;  %1717 = vtanh.f32 %v433_v2 }
 0x100   : > { %v1708_v6 = vpop.eup %1707  ;;  %1719 = vtanh.f32 %v425_v4 }
 0x101   : > { %v1710_v7 = vpop.eup %1709 }
 0x102   : > { %v1712_v8 = vpop.eup %1711  ;;  %v1605_v9 = vpop.f32.mrb[12].mxu0  ;;  %v471_v10 = vpack.c.bf16 %v1710_v7, %v1706_v5 }
 0x103   : > { %v446_v11 = vadd.f32 %v1605_v9, %v1514_v38  ;;  %v437_v12 = vpop.f32.mrb[13].mxu0  ;;  %v470_v13 = vpack.c.bf16 %v1712_v8, %v1708_v6 }
 0x104   : > { %v438_v14 = vadd.f32 %v1514_v38, %v437_v12  ;;  %v1606_v15 = vpop.f32.mrb[14].mxu0 }
 0x105   : > { %1721 = vtanh.f32 %v446_v11  ;;  %v449_v16 = vadd.f32 %v1606_v15, %v1514_v38  ;;  %v440_v17 = vpop.f32.mrb[15].mxu0  ;;  %1627 = vmatprep.mubr.bf16.mxu1 %v470_v13 }
 0x106   : > { %1723 = vtanh.f32 %v438_v14  ;;  %v441_v18 = vadd.f32 %v1514_v38, %v440_v17  ;;  %1628 = vmatmul.mubr.bf16.gmra.mrb[4].mxu1 %v471_v10 }
 0x107   : > { %v1714_v19 = vpop.eup %1713  ;;  %1725 = vtanh.f32 %v449_v16 }
 0x108   : > { %v1716_v20 = vpop.eup %1715  ;;  %1727 = vtanh.f32 %v441_v18 }
 0x109   : > { %v1718_v21 = vpop.eup %1717 }
 0x10a   : > { %v1720_v22 = vpop.eup %1719  ;;  %v473_v23 = vpack.c.bf16 %v1718_v21, %v1714_v19 }
 0x10b   : > { %v472_v24 = vpack.c.bf16 %v1720_v22, %v1716_v20 }
 0x10d   : > { %1631 = vmatprep.mubr.bf16.mxu1 %v472_v24 }
 0x10e   : > { %1632 = vmatmul.mubr.bf16.gmra.mrb[8].mxu1 %v473_v23 }
 0x10f   : > { %v1722_v25 = vpop.eup %1721 }
 0x110   : > { %v1724_v26 = vpop.eup %1723 }
 0x111   : > { %v1726_v27 = vpop.eup %1725 }
 0x112   : > { %v1728_v28 = vpop.eup %1727  ;;  %v475_v29 = vpack.c.bf16 %v1726_v27, %v1722_v25 }
 0x113   : > { %v474_v30 = vpack.c.bf16 %v1728_v28, %v1724_v26  ;;  %v836_v28 = vlaneseq }
 0x115   : > { %1635 = vmatprep.mubr.bf16.mxu1 %v474_v30  ;;  %v1534_v30 = vld [vmem:[%s2904_s6] ss:$0 sm:$0xff] }
 0x116   : > { %1636 = vmatmul.mubr.bf16.gmra.mrb[12].mxu1 %v475_v29  ;;  %v2007_v29 = vand.u32 127, %v836_v28 }
 0x118   : > { %vm838_vm1 = vcmp.lt.s32.totalorder %v2007_v29, 6 }
 0x1d1   : > { %v1625_v36 = vpop.f32.mrb[0].mxu1 }
 0x1d2   : > { %v590_v37 = vadd.f32 %v1625_v36, %v1525_v35  ;;  %v581_v38 = vpop.f32.mrb[1].mxu1 }
 0x1d3   : > { %v582_v39 = vadd.f32 %v1525_v35, %v581_v38  ;;  %v1626_v40 = vpop.f32.mrb[2].mxu1 }
 0x1d4   : > { %1729 = vtanh.f32 %v590_v37  ;;  %v593_v41 = vadd.f32 %v1626_v40, %v1525_v35  ;;  %v584_v42 = vpop.f32.mrb[3].mxu1 }
 0x1d5   : > { %1731 = vtanh.f32 %v582_v39  ;;  %v585_v43 = vadd.f32 %v1525_v35, %v584_v42 }
 0x1d6   : > { %1733 = vtanh.f32 %v593_v41 }
 0x1d7   : > { %1735 = vtanh.f32 %v585_v43 }
 0x1d9   : > { %v1629_v44 = vpop.f32.mrb[4].mxu1 }
 0x1da   : > { %v606_v45 = vadd.f32 %v1629_v44, %v1525_v35  ;;  %v597_v46 = vpop.f32.mrb[5].mxu1 }
 0x1db   : > { %v598_v47 = vadd.f32 %v1525_v35, %v597_v46  ;;  %v1630_v48 = vpop.f32.mrb[6].mxu1 }
 0x1dc   : > { %1737 = vtanh.f32 %v606_v45  ;;  %v609_v49 = vadd.f32 %v1630_v48, %v1525_v35  ;;  %v600_v50 = vpop.f32.mrb[7].mxu1 }
 0x1dd   : > { %1739 = vtanh.f32 %v598_v47  ;;  %v601_v51 = vadd.f32 %v1525_v35, %v600_v50 }
 0x1de   : > { %v1730_v52 = vpop.eup %1729  ;;  %1741 = vtanh.f32 %v609_v49 }
 0x1df   : > { %v1732_v53 = vpop.eup %1731  ;;  %1743 = vtanh.f32 %v601_v51 }
 0x1e0   : > { %v1734_v54 = vpop.eup %1733 }
 0x1e1   : > { %v1736_v55 = vpop.eup %1735  ;;  %v1633_v56 = vpop.f32.mrb[8].mxu1  ;;  %v661_v57 = vpack.c.bf16 %v1734_v54, %v1730_v52 }
 0x1e2   : > { %v622_v58 = vadd.f32 %v1633_v56, %v1525_v35  ;;  %v613_v59 = vpop.f32.mrb[9].mxu1  ;;  %v660_v60 = vpack.c.bf16 %v1736_v55, %v1732_v53 }
 0x1e3   : > { %v614_v61 = vadd.f32 %v1525_v35, %v613_v59  ;;  %v1634_v62 = vpop.f32.mrb[10].mxu1 }
 0x1e4   : > { %1745 = vtanh.f32 %v622_v58  ;;  %v625_v63 = vadd.f32 %v1634_v62, %v1525_v35  ;;  %v616_v0 = vpop.f32.mrb[11].mxu1  ;;  %1655 = vmatprep.mubr.bf16.mxu0 %v660_v60 }
 0x1e5   : > { %1747 = vtanh.f32 %v614_v61  ;;  %v617_v1 = vadd.f32 %v1525_v35, %v616_v0  ;;  %1656 = vmatmul.mubr.bf16.vlgmr.msra.gmra.mrb[16].mxu0 %v661_v57 }
 0x1e6   : > { %v1738_v2 = vpop.eup %1737  ;;  %1749 = vtanh.f32 %v625_v63 }
 0x1e7   : > { %v1740_v3 = vpop.eup %1739  ;;  %1751 = vtanh.f32 %v617_v1 }
 0x1e8   : > { %v1742_v4 = vpop.eup %1741 }
 0x1e9   : > { %v1744_v5 = vpop.eup %1743  ;;  %v1637_v6 = vpop.f32.mrb[12].mxu1  ;;  %v663_v7 = vpack.c.bf16 %v1742_v4, %v1738_v2 }
 0x1ea   : > { %v638_v8 = vadd.f32 %v1637_v6, %v1525_v35  ;;  %v629_v9 = vpop.f32.mrb[13].mxu1  ;;  %v662_v10 = vpack.c.bf16 %v1744_v5, %v1740_v3 }
 0x1eb   : > { %v630_v11 = vadd.f32 %v1525_v35, %v629_v9  ;;  %v1638_v12 = vpop.f32.mrb[14].mxu1 }
 0x1ec   : > { %1753 = vtanh.f32 %v638_v8  ;;  %v641_v13 = vadd.f32 %v1638_v12, %v1525_v35  ;;  %v632_v14 = vpop.f32.mrb[15].mxu1  ;;  %1659 = vmatprep.mubr.bf16.mxu0 %v662_v10 }
 0x1ed   : > { %1755 = vtanh.f32 %v630_v11  ;;  %v633_v15 = vadd.f32 %v1525_v35, %v632_v14  ;;  %1660 = vmatmul.mubr.bf16.gmra.mrb[20].mxu0 %v663_v7 }
 0x1ee   : > { %v1746_v16 = vpop.eup %1745  ;;  %1757 = vtanh.f32 %v641_v13 }
 0x1ef   : > { %v1748_v17 = vpop.eup %1747  ;;  %1759 = vtanh.f32 %v633_v15 }
 0x1f0   : > { %v1750_v18 = vpop.eup %1749 }
 0x1f1   : > { %v1752_v19 = vpop.eup %1751  ;;  %v665_v20 = vpack.c.bf16 %v1750_v18, %v1746_v16 }
 0x1f2   : > { %v664_v21 = vpack.c.bf16 %v1752_v19, %v1748_v17 }
 0x1f4   : > { %1663 = vmatprep.mubr.bf16.mxu0 %v664_v21 }
 0x1f5   : > { %1664 = vmatmul.mubr.bf16.gmra.mrb[24].mxu0 %v665_v20 }
 0x1f6   : > { %v1754_v22 = vpop.eup %1753 }
 0x1f7   : > { %v1756_v23 = vpop.eup %1755 }
 0x1f8   : > { %v1758_v24 = vpop.eup %1757 }
 0x1f9   : > { %v1760_v25 = vpop.eup %1759  ;;  %v667_v26 = vpack.c.bf16 %v1758_v24, %v1754_v22 }
 0x1fa   : > { %v666_v27 = vpack.c.bf16 %v1760_v25, %v1756_v23 }
 0x1fc   : > { %1667 = vmatprep.mubr.bf16.mxu0 %v666_v27 }
 0x1fd   : > { %1668 = vmatmul.mubr.bf16.gmra.mrb[28].mxu0 %v667_v26 }
 0x2b8   : > { %v1657_v31 = vpop.f32.mrb[16].mxu0 }
 0x2b9   : > { %v2013_v32 = vadd.f32 %v1657_v31, %v1534_v30  ;;  %v773_v33 = vpop.f32.mrb[17].mxu0 }
 0x2ba   : > { %v2015_v34 = vadd.f32 %v1534_v30, %v773_v33  ;;  %v1658_v35 = vpop.f32.mrb[18].mxu0 }
 0x2bb   : > { %2934 = vst [vmem:[#allocation2_spill] sm:$0xff] %v2013_v32  ;;  %v2017_v36 = vadd.f32 %v1658_v35, %v1534_v30  ;;  %v776_v37 = vpop.f32.mrb[19].mxu0  ;;  %v2022_v38 = vsel %vm838_vm1, %v2013_v32, -inf }
 0x2bc   : > { %v2024_v39 = vadd.f32 %v1534_v30, %v776_v37  ;;  %859 = vmax.xlane.f32.xlu1 %v2022_v38  ;;  %v2030_v40 = vsel %vm838_vm1, %v2015_v34, -inf }
 0x2bd   : > { %2935 = vst [vmem:[#allocation3_spill] sm:$0xff] %v2017_v36  ;;  %855 = vmax.xlane.f32.xlu0 %v2030_v40  ;;  %v2036_v41 = vsel %vm838_vm1, %v2017_v36, -inf }
 0x2be   : > { %2936 = vst [vmem:[#allocation4_spill] sm:$0xff] %v2024_v39  ;;  %v2042_v43 = vsel %vm838_vm1, %v2024_v39, -inf }
 0x2c0   : > { %861 = vmax.xlane.f32.xlu1 %v2036_v41  ;;  %v1661_v42 = vpop.f32.mrb[20].mxu0 }
 0x2c1   : > { %v2044_v44 = vadd.f32 %v1661_v42, %v1534_v30  ;;  %v789_v45 = vpop.f32.mrb[21].mxu0  ;;  %857 = vmax.xlane.f32.xlu0 %v2042_v43 }
 0x2c2   : > { %v1662_v46 = vpop.f32.mrb[22].mxu0  ;;  %v2054_v50 = vadd.f32 %v1534_v30, %v789_v45 }
 0x2c3   : > { %2937 = vst [vmem:[#allocation5_spill] sm:$0xff] %v2044_v44  ;;  %v2047_v47 = vadd.f32 %v1662_v46, %v1534_v30  ;;  %v792_v48 = vpop.f32.mrb[23].mxu0  ;;  %v2052_v49 = vsel %vm838_vm1, %v2044_v44, -inf }
 0x2c4   : > { %2939 = vst [vmem:[#allocation7_spill] sm:$0xff] %v2054_v50  ;;  %v2056_v51 = vadd.f32 %v1534_v30, %v792_v48  ;;  %v2068_v54 = vsel %vm838_vm1, %v2054_v50, -inf }
 0x2c5   : > { %2938 = vst [vmem:[#allocation6_spill] sm:$0xff] %v2047_v47  ;;  %867 = vmax.xlane.f32.xlu0 %v2052_v49  ;;  %v2062_v52 = vsel %vm838_vm1, %v2047_v47, -inf }
 0x2c6   : > { %2940 = vst [vmem:[#allocation8_spill] sm:$0xff] %v2056_v51  ;;  %869 = vmax.xlane.f32.xlu1 %v2062_v52  ;;  %v2076_v57 = vsel %vm838_vm1, %v2056_v51, -inf }
 0x2c8   : > { %v1665_v53 = vpop.f32.mrb[24].mxu0 }
 0x2c9   : > { %v2070_v55 = vadd.f32 %v1665_v53, %v1534_v30  ;;  %v805_v56 = vpop.f32.mrb[25].mxu0  ;;  %863 = vmax.xlane.f32.xlu0 %v2068_v54 }
 0x2ca   : > { %v1666_v58 = vpop.f32.mrb[26].mxu0  ;;  %865 = vmax.xlane.f32.xlu1 %v2076_v57  ;;  %v2086_v62 = vadd.f32 %v1534_v30, %v805_v56 }
 0x2cb   : > { %2941 = vst [vmem:[#allocation9_spill] sm:$0xff] %v2070_v55  ;;  %v2079_v59 = vadd.f32 %v1666_v58, %v1534_v30  ;;  %v808_v60 = vpop.f32.mrb[27].mxu0  ;;  %v2084_v61 = vsel %vm838_vm1, %v2070_v55, -inf }
 0x2cc   : > { %2943 = vst [vmem:[#allocation11_spill] sm:$0xff] %v2086_v62  ;;  %v2088_v63 = vadd.f32 %v1534_v30, %v808_v60  ;;  %v2100_v2 = vsel %vm838_vm1, %v2086_v62, -inf }
 0x2cd   : > { %2942 = vst [vmem:[#allocation10_spill] sm:$0xff] %v2079_v59  ;;  %875 = vmax.xlane.f32.xlu0 %v2084_v61  ;;  %v2094_v0 = vsel %vm838_vm1, %v2079_v59, -inf }
 0x2ce   : > { %2944 = vst [vmem:[#allocation12_spill] sm:$0xff] %v2088_v63  ;;  %877 = vmax.xlane.f32.xlu1 %v2094_v0  ;;  %v2106_v4 = vsel %vm838_vm1, %v2088_v63, -inf }
 0x2d0   : > { %v1669_v1 = vpop.f32.mrb[28].mxu0 }
 0x2d1   : > { %v821_v3 = vpop.f32.mrb[29].mxu0  ;;  %871 = vmax.xlane.f32.xlu0 %v2100_v2  ;;  %v2111_v8 = vadd.f32 %v1669_v1, %v1534_v30 }
 0x2d2   : > { %v2108_v5 = vadd.f32 %v1534_v30, %v821_v3  ;;  %v1670_v6 = vpop.f32.mrb[30].mxu0  ;;  %873 = vmax.xlane.f32.xlu1 %v2106_v4 }
 0x2d3   : > { %v824_v7 = vpop.f32.mrb[31].mxu0  ;;  %2946 = vst [vmem:[#allocation14_spill] sm:$0xff] %v2111_v8  ;;  %v2121_v11 = vadd.f32 %v1670_v6, %v1534_v30  ;;  %v2132_v13 = vsel %vm838_vm1, %v2111_v8, -inf }
 0x2d4   : > { %2945 = vst [vmem:[#allocation13_spill] sm:$0xff] %v2108_v5  ;;  %v2113_v9 = vadd.f32 %v1534_v30, %v824_v7  ;;  %v2118_v10 = vsel %vm838_vm1, %v2108_v5, -inf }
 0x2d5   : > { %879 = vmax.xlane.f32.xlu0 %v2118_v10  ;;  %2948 = vst [vmem:[#allocation16_spill] sm:$0xff] %v2121_v11  ;;  %v2138_v14 = vsel %vm838_vm1, %v2121_v11, -inf }
 0x2d6   : > { %2947 = vst [vmem:[#allocation15_spill] sm:$0xff] %v2113_v9  ;;  %v2126_v12 = vsel %vm838_vm1, %v2113_v9, -inf }
 0x2d7   : > { %881 = vmax.xlane.f32.xlu1 %v2126_v12 }
 0x2d9   : > { %883 = vmax.xlane.f32.xlu0 %v2132_v13 }
 0x2db   : > { %885 = vmax.xlane.f32.xlu1 %v2138_v14 }
 0x349   : > { %v2141_v15 = vpop.xlane.xlu1 %859 }
 0x34a   : > { %vm1001_vm2 = vcmp.eq.f32.partialorder %v2022_v38, %v2141_v15  ;;  %v856_v16 = vpop.xlane.xlu0 %855  ;;  %v2264_v62 = vsub.f32 %v2022_v38, %v2141_v15 }
 0x34b   : > { %v2146_v17 = vsel %vm1001_vm2, %v2007_v29, 128  ;;  %vm999_vm3 = vcmp.eq.f32.partialorder %v2030_v40, %v856_v16  ;;  %v2236_v5 = vsub.f32 %v2030_v40, %v856_v16 }
 0x34c   : > { %v2150_v18 = vsel %vm999_vm3, %v2007_v29, 128  ;;  %v1060_v19 = vshra.s32 %v2146_v17, 16  ;;  %2950 = vst [vmem:[#allocation18_spill] sm:$0xff] %v2264_v62  ;;  %v907_v36 = vmul.f32 1.442695, %v2264_v62 }
 0x34d   : > { %v2153_v20 = vpop.xlane.xlu1 %861  ;;  %v1032_v23 = vshra.s32 %v2150_v18, 16 }
 0x34e   : > { %vm1002_vm4 = vcmp.eq.f32.partialorder %v2036_v41, %v2153_v20  ;;  %v858_v21 = vpop.xlane.xlu0 %857  ;;  %v2157_v22 = vcvt.s32.f32 %v1060_v19 }
 0x34f   : > { %v2161_v24 = vsel %vm1002_vm4, %v2007_v29, 128  ;;  %vm1000_vm5 = vcmp.eq.f32.partialorder %v2042_v43, %v858_v21  ;;  %v2173_v30 = vcvt.s32.f32 %v1032_v23 }
 0x350   : > { %v2165_v25 = vsel %vm1000_vm5, %v2007_v29, 128  ;;  %1063 = vmin.xlane.f32.xlu0 %v2157_v22  ;;  %v1074_v26 = vshra.s32 %v2161_v24, 16 }
 0x351   : > { %v1046_v31 = vshra.s32 %v2165_v25, 16 }
 0x352   : > { %v2169_v27 = vpop.xlane.xlu0 %867  ;;  %v2171_v28 = vcvt.s32.f32 %v1074_v26 }
 0x353   : > { %vm1005_vm6 = vcmp.eq.f32.partialorder %v2052_v49, %v2169_v27  ;;  %v2178_v33 = vpop.xlane.xlu1 %869  ;;  %v2191_v46 = vcvt.s32.f32 %v1046_v31 }
 0x354   : > { %v2181_v35 = vsel %vm1005_vm6, %v2007_v29, 128  ;;  %vm1006_vm7 = vcmp.eq.f32.partialorder %v2062_v52, %v2178_v33  ;;  %1077 = vmin.xlane.f32.xlu1 %v2171_v28  ;;  %1035 = vmin.xlane.f32.xlu0 %v2173_v30 }
 0x355   : > { %v2188_v37 = vsel %vm1006_vm7, %v2007_v29, 128  ;;  %v1116_v42 = vshra.s32 %v2181_v35, 16 }
 0x356   : > { %v864_v45 = vpop.xlane.xlu0 %863  ;;  %v1130_v48 = vshra.s32 %v2188_v37, 16 }
 0x357   : > { %vm1003_vm8 = vcmp.eq.f32.partialorder %v2068_v54, %v864_v45  ;;  %v2195_v53 = vpop.xlane.xlu1 %865  ;;  %v2197_v56 = vcvt.s32.f32 %v1116_v42 }
 0x358   : > { %v2200_v58 = vsel %vm1003_vm8, %v2007_v29, 128  ;;  %vm1004_vm9 = vcmp.eq.f32.partialorder %v2076_v57, %v2195_v53  ;;  %1049 = vmin.xlane.f32.xlu1 %v2191_v46  ;;  %v2212_v6 = vcvt.s32.f32 %v1130_v48 }
 0x359   : > { %v2206_v60 = vsel %vm1004_vm9, %v2007_v29, 128  ;;  %1119 = vmin.xlane.f32.xlu0 %v2197_v56  ;;  %v1088_v1 = vshra.s32 %v2200_v58, 16 }
 0x35a   : > { %v2210_v3 = vpop.xlane.xlu0 %875  ;;  %v1102_v7 = vshra.s32 %v2206_v60, 16 }
 0x35b   : > { %vm1009_vm10 = vcmp.eq.f32.partialorder %v2084_v61, %v2210_v3  ;;  %v2217_v19 = vpop.xlane.xlu1 %877  ;;  %v2219_v23 = vcvt.s32.f32 %v1088_v1 }
 0x35c   : > { %v2222_v26 = vsel %vm1009_vm10, %v2007_v29, 128  ;;  %vm1010_vm11 = vcmp.eq.f32.partialorder %v2094_v0, %v2217_v19  ;;  %1133 = vmin.xlane.f32.xlu1 %v2212_v6  ;;  %v2232_v9 = vcvt.s32.f32 %v1102_v7  ;;  %v2250_v7 = vsub.f32 %v2042_v43, %v858_v21 }
 0x35d   : > { %v2228_v31 = vsel %vm1010_vm11, %v2007_v29, 128  ;;  %1091 = vmin.xlane.f32.xlu0 %v2219_v23  ;;  %v1172_v42 = vshra.s32 %v2222_v26, 16  ;;  %v903_v43 = vmul.f32 1.442695, %v2236_v5 }
 0x35e   : > { %v872_v48 = vpop.xlane.xlu0 %871  ;;  %v1186_v1 = vshra.s32 %v2228_v31, 16  ;;  %2949 = vst [vmem:[#allocation17_spill] sm:$0xff] %v2250_v7  ;;  %v905_v38 = vmul.f32 1.442695, %v2250_v7 }
 0x35f   : > { %vm1007_vm12 = vcmp.eq.f32.partialorder %v2100_v2, %v872_v48  ;;  %v2239_v11 = vpop.xlane.xlu1 %873  ;;  %v2241_v8 = vcvt.s32.f32 %v1172_v42  ;;  %1761 = vpow2.f32 %v903_v43  ;;  %v2306_v43 = vsub.f32 %v2076_v57, %v2195_v53 }
 0x360   : > { %v2244_v63 = vsel %vm1007_vm12, %v2007_v29, 128  ;;  %vm1008_vm13 = vcmp.eq.f32.partialorder %v2106_v4, %v2239_v11  ;;  %1105 = vmin.xlane.f32.xlu1 %v2232_v9  ;;  %v2259_v55 = vcvt.s32.f32 %v1186_v1  ;;  %v2279_v1 = vsub.f32 %v2036_v41, %v2153_v20 }
 0x361   : > { %v2253_v40 = vsel %vm1008_vm13, %v2007_v29, 128  ;;  %1175 = vmin.xlane.f32.xlu0 %v2241_v8  ;;  %v1144_v16 = vshra.s32 %v2244_v63, 16  ;;  %v2293_v41 = vsub.f32 %v2068_v54, %v864_v45  ;;  %1763 = vpow2.f32 %v905_v38 }
 0x362   : > { %v2257_v42 = vpop.xlane.xlu0 %879  ;;  %v1158_v59 = vshra.s32 %v2253_v40, 16  ;;  %2951 = vst [vmem:[#allocation19_spill] sm:$0xff] %v2279_v1  ;;  %1765 = vpow2.f32 %v907_v36  ;;  %v913_v62 = vmul.f32 1.442695, %v2306_v43 }
 0x363   : > { %vm1011_vm14 = vcmp.eq.f32.partialorder %v2118_v10, %v2257_v42  ;;  %v2269_v21 = vcvt.s32.f32 %v1144_v16  ;;  %v911_v38 = vmul.f32 1.442695, %v2293_v41 }
 0x364   : > { %v2272_v47 = vsel %vm1011_vm14, %v2007_v29, 128  ;;  %v2274_v44 = vpop.xlane.xlu1 %881  ;;  %1189 = vmin.xlane.f32.xlu1 %v2259_v55  ;;  %v2289_v50 = vcvt.s32.f32 %v1158_v59  ;;  %v909_v59 = vmul.f32 1.442695, %v2279_v1  ;;  %v2318_v1 = vsub.f32 %v2052_v49, %v2169_v27 }
 0x365   : > { %vm1012_vm15 = vcmp.eq.f32.partialorder %v2126_v12, %v2274_v44  ;;  %1147 = vmin.xlane.f32.xlu0 %v2269_v21  ;;  %v1200_v15 = vshra.s32 %v2272_v47, 16  ;;  %v2335_v27 = vsub.f32 %v2100_v2, %v872_v48  ;;  %v2350_v2 = vsub.f32 %v2084_v61, %v2210_v3 }
 0x366   : > { %v2287_v16 = vsel %vm1012_vm15, %v2007_v29, 128  ;;  %v884_v51 = vpop.xlane.xlu0 %883  ;;  %1767 = vpow2.f32 %v909_v59  ;;  %v915_v49 = vmul.f32 1.442695, %v2318_v1 }
 0x367   : > { %vm1013_vm0 = vcmp.eq.f32.partialorder %v2132_v13, %v884_v51  ;;  %v2300_v7 = vcvt.s32.f32 %v1200_v15  ;;  %v1214_v39 = vshra.s32 %v2287_v16, 16  ;;  %1769 = vpow2.f32 %v911_v38 }
 0x368   : > { %v2297_v20 = vsel %vm1013_vm0, %v2007_v29, 128  ;;  %v886_v32 = vpop.xlane.xlu1 %885  ;;  %1161 = vmin.xlane.f32.xlu1 %v2289_v50  ;;  %1771 = vpow2.f32 %v913_v62  ;;  %v919_v48 = vmul.f32 1.442695, %v2335_v27  ;;  %v923_v61 = vmul.f32 1.442695, %v2350_v2 }
 0x369   : > { %vm1014_vm2 = vcmp.eq.f32.partialorder %v2138_v14, %v886_v32  ;;  %1203 = vmin.xlane.f32.xlu0 %v2300_v7  ;;  %v2313_v45 = vcvt.s32.f32 %v1214_v39  ;;  %v1228_v15 = vshra.s32 %v2297_v20, 16  ;;  %v2327_v39 = vsub.f32 %v2062_v52, %v2178_v33 }
 0x36a   : > { %v2310_v54 = vsel %vm1014_vm2, %v2007_v29, 128  ;;  %v2343_v52 = vsub.f32 %v2094_v0, %v2217_v19  ;;  %1773 = vpow2.f32 %v915_v49  ;;  %v2359_v0 = vsub.f32 %v2106_v4, %v2239_v11 }
 0x36b   : > { %v1242_v57 = vshra.s32 %v2310_v54, 16  ;;  %v2323_v53 = vcvt.s32.f32 %v1228_v15  ;;  %v2338_v15 = vpop.eup %1761  ;;  %v917_v59 = vmul.f32 1.442695, %v2327_v39  ;;  %v2366_v3 = vsub.f32 %v2132_v13, %v884_v51 }
 0x36c   : > { %1217 = vmin.xlane.f32.xlu1 %v2313_v45  ;;  %v2346_v33 = vpop.eup %1763  ;;  %v925_v62 = vmul.f32 1.442695, %v2343_v52  ;;  %2952 = vst [vmem:[#allocation20_spill] sm:$0xff] %v2359_v0  ;;  %v921_v49 = vmul.f32 1.442695, %v2359_v0  ;;  %v2373_v4 = vsub.f32 %v2138_v14, %v886_v32  ;;  %v2388_v32 = vsub.f32 %v2126_v12, %v2274_v44 }
 0x36d   : > { %v2330_v36 = vcvt.s32.f32 %v1242_v57  ;;  %1231 = vmin.xlane.f32.xlu0 %v2323_v53  ;;  %v2354_v38 = vpop.eup %1765  ;;  %1775 = vpow2.f32 %v917_v59  ;;  %2953 = vst [vmem:[#allocation21_spill] sm:$0xff] %v2366_v3  ;;  %v2380_v59 = vsub.f32 %v2118_v10, %v2257_v42  ;;  %v931_v51 = vmul.f32 1.442695, %v2366_v3 }
 0x36e   : > { %1777 = vpow2.f32 %v919_v48  ;;  %2954 = vst [vmem:[#allocation22_spill] sm:$0xff] %v2373_v4  ;;  %2956 = vst [vmem:[#allocation24_spill] sm:$0xff] %v2388_v32  ;;  %v933_v14 = vmul.f32 1.442695, %v2373_v4 }
 0x36f   : > { %1779 = vpow2.f32 %v925_v62  ;;  %2955 = vst [vmem:[#allocation23_spill] sm:$0xff] %v2380_v59  ;;  %v927_v10 = vmul.f32 1.442695, %v2380_v59  ;;  %v929_v62 = vmul.f32 1.442695, %v2388_v32  ;;  %v1073_v32 = vand.u32 65535, %v2161_v24 }
 0x370   : > { %1245 = vmin.xlane.f32.xlu1 %v2330_v36  ;;  %v2362_v19 = vpop.eup %1767  ;;  %1781 = vpow2.f32 %v923_v61 }
 0x371   : > { %935 = vadd.xlane.f32.xlu0 %v2338_v15  ;;  %v2369_v57 = vpop.eup %1769  ;;  %1783 = vpow2.f32 %v921_v49  ;;  %v1075_v0 = vcvt.s32.f32 %v1073_v32  ;;  %v1129_v32 = vand.u32 65535, %v2188_v37  ;;  %v1101_v37 = vand.u32 65535, %v2206_v60 }
 0x372   : > { %v2376_v11 = vpop.eup %1771  ;;  %1785 = vpow2.f32 %v931_v51  ;;  %v1185_v60 = vand.u32 65535, %v2228_v31  ;;  %v1157_v31 = vand.u32 65535, %v2253_v40  ;;  %v1213_v40 = vand.u32 65535, %v2287_v16 }
 0x373   : > { %1787 = vpow2.f32 %v933_v14 }
 0x374   : > { %937 = vadd.xlane.f32.xlu1 %v2346_v33  ;;  %v2384_v13 = vpop.eup %1773  ;;  %1789 = vpow2.f32 %v927_v10 }
 0x375   : > { %939 = vadd.xlane.f32.xlu0 %v2354_v38  ;;  %1791 = vpow2.f32 %v929_v62  ;;  %v1059_v62 = vand.u32 65535, %v2146_v17  ;;  %v1045_v17 = vand.u32 65535, %v2165_v25 }
 0x377   : > { %v2392_v48 = vpop.eup %1775  ;;  %v1061_v3 = vcvt.s32.f32 %v1059_v62 }
 0x378   : > { %941 = vadd.xlane.f32.xlu1 %v2362_v19  ;;  %v2396_v42 = vpop.eup %1777 }
 0x379   : > { %943 = vadd.xlane.f32.xlu0 %v2369_v57  ;;  %v2400_v44 = vpop.eup %1779 }
 0x37a   : > { %v2403_v12 = vpop.eup %1781 }
 0x37b   : > { %v2406_v61 = vpop.eup %1783 }
 0x37c   : > { %945 = vadd.xlane.f32.xlu1 %v2376_v11  ;;  %v2409_v49 = vpop.eup %1785 }
 0x37d   : > { %947 = vadd.xlane.f32.xlu0 %v2384_v13  ;;  %2957 = vst [vmem:[#allocation25_spill] sm:$0xff] %v2409_v49  ;;  %v2412_v51 = vpop.eup %1787 }
 0x37e   : > { %2958 = vst [vmem:[#allocation26_spill] sm:$0xff] %v2412_v51  ;;  %v2415_v14 = vpop.eup %1789 }
 0x37f   : > { %2959 = vst [vmem:[#allocation27_spill] sm:$0xff] %v2415_v14  ;;  %v2418_v10 = vpop.eup %1791 }
 0x380   : > { %949 = vadd.xlane.f32.xlu1 %v2392_v48  ;;  %2960 = vst [vmem:[#allocation28_spill] sm:$0xff] %v2418_v10 }
 0x381   : > { %951 = vadd.xlane.f32.xlu0 %v2396_v42 }
 0x384   : > { %957 = vadd.xlane.f32.xlu1 %v2400_v44 }
 0x385   : > { %955 = vadd.xlane.f32.xlu0 %v2403_v12 }
 0x388   : > { %953 = vadd.xlane.f32.xlu1 %v2406_v61 }
 0x389   : > { %963 = vadd.xlane.f32.xlu0 %v2409_v49  ;;  %v1031_v49 = vand.u32 65535, %v2150_v18  ;;  %v1115_v18 = vand.u32 65535, %v2181_v35 }
 0x38b   : > { %v1117_v25 = vcvt.s32.f32 %v1115_v18 }
 0x38c   : > { %965 = vadd.xlane.f32.xlu1 %v2412_v51 }
 0x38d   : > { %959 = vadd.xlane.f32.xlu0 %v2415_v14 }
 0x390   : > { %961 = vadd.xlane.f32.xlu1 %v2418_v10  ;;  %v1033_v10 = vcvt.s32.f32 %v1031_v49 }
 0x3dd   : > { %v2422_v4 = vpop.xlane.xlu0 %1063 }
 0x3de   : > { %vm1065_vm3 = vcmp.eq.f32.partialorder %v2157_v22, %v2422_v4 }
 0x3df   : > { %v1066_v51 = vsel %vm1065_vm3, %v1061_v3, inf }
 0x3e0   : > { %1067 = vmin.xlane.f32.xlu0 %v1066_v51  ;;  %v1047_v51 = vcvt.s32.f32 %v1045_v17 }
 0x3e1   : > { %v2428_v59 = vpop.xlane.xlu1 %1077  ;;  %v2430_v14 = vpop.xlane.xlu0 %1035 }
 0x3e2   : > { %vm1079_vm4 = vcmp.eq.f32.partialorder %v2171_v28, %v2428_v59  ;;  %vm1037_vm5 = vcmp.eq.f32.partialorder %v2173_v30, %v2430_v14  ;;  %v1087_v28 = vand.u32 65535, %v2200_v58  ;;  %v1171_v58 = vand.u32 65535, %v2222_v26 }
 0x3e3   : > { %v1080_v24 = vsel %vm1079_vm4, %v1075_v0, inf  ;;  %v1038_v22 = vsel %vm1037_vm5, %v1033_v10, inf  ;;  %v1131_v10 = vcvt.s32.f32 %v1129_v32  ;;  %v1143_v26 = vand.u32 65535, %v2244_v63 }
 0x3e4   : > { %1081 = vmin.xlane.f32.xlu1 %v1080_v24  ;;  %1039 = vmin.xlane.f32.xlu0 %v1038_v22  ;;  %v1103_v24 = vcvt.s32.f32 %v1101_v37  ;;  %v1199_v63 = vand.u32 65535, %v2272_v47  ;;  %vm1383_vm4 = vcmp.eq.s32.totalorder %v2007_v29, 126 }
 0x3e5   : > { %v2438_v3 = vpop.xlane.xlu1 %1049 }
 0x3e6   : > { %v2441_v49 = vpop.xlane.xlu0 %1119  ;;  %vm1051_vm6 = vcmp.eq.f32.partialorder %v2191_v46, %v2438_v3  ;;  %v1089_v46 = vcvt.s32.f32 %v1087_v28 }
 0x3e7   : > { %v1052_v30 = vsel %vm1051_vm6, %v1047_v51, inf  ;;  %vm1121_vm7 = vcmp.eq.f32.partialorder %v2197_v56, %v2441_v49 }
 0x3e8   : > { %1053 = vmin.xlane.f32.xlu1 %v1052_v30  ;;  %v1122_v35 = vsel %vm1121_vm7, %v1117_v25, inf  ;;  %v1187_v25 = vcvt.s32.f32 %v1185_v60 }
 0x3e9   : > { %v2448_v0 = vpop.xlane.xlu1 %1133  ;;  %1123 = vmin.xlane.f32.xlu0 %v1122_v35 }
 0x3ea   : > { %v2451_v62 = vpop.xlane.xlu0 %1091  ;;  %vm1135_vm8 = vcmp.eq.f32.partialorder %v2212_v6, %v2448_v0  ;;  %v1173_v6 = vcvt.s32.f32 %v1171_v58  ;;  %v1227_v58 = vand.u32 65535, %v2297_v20 }
 0x3eb   : > { %v1136_v17 = vsel %vm1135_vm8, %v1131_v10, inf  ;;  %vm1093_vm9 = vcmp.eq.f32.partialorder %v2219_v23, %v2451_v62  ;;  %v1159_v10 = vcvt.s32.f32 %v1157_v31 }
 0x3ec   : > { %1137 = vmin.xlane.f32.xlu1 %v1136_v17  ;;  %v1094_v56 = vsel %vm1093_vm9, %v1089_v46, inf  ;;  %v1201_v46 = vcvt.s32.f32 %v1199_v63  ;;  %v1215_v17 = vcvt.s32.f32 %v1213_v40 }
 0x3ed   : > { %v2458_v18 = vpop.xlane.xlu1 %1105  ;;  %1095 = vmin.xlane.f32.xlu0 %v1094_v56  ;;  %v1241_v56 = vand.u32 65535, %v2310_v54 }
 0x3ee   : > { %v2461_v22 = vpop.xlane.xlu0 %1175  ;;  %vm1107_vm10 = vcmp.eq.f32.partialorder %v2232_v9, %v2458_v18  ;;  %v1145_v9 = vcvt.s32.f32 %v1143_v26 }
 0x3ef   : > { %v1108_v51 = vsel %vm1107_vm10, %v1103_v24, inf  ;;  %vm1177_vm11 = vcmp.eq.f32.partialorder %v2241_v8, %v2461_v22  ;;  %v1229_v24 = vcvt.s32.f32 %v1227_v58  ;;  %v1243_v60 = vcvt.s32.f32 %v1241_v56 }
 0x3f0   : > { %1109 = vmin.xlane.f32.xlu1 %v1108_v51  ;;  %v1178_v23 = vsel %vm1177_vm11, %v1173_v6, inf }
 0x3f1   : > { %v2468_v32 = vpop.xlane.xlu1 %1189  ;;  %1179 = vmin.xlane.f32.xlu0 %v1178_v23 }
 0x3f2   : > { %v2471_v28 = vpop.xlane.xlu0 %1147  ;;  %vm1191_vm12 = vcmp.eq.f32.partialorder %v2259_v55, %v2468_v32 }
 0x3f3   : > { %v1192_v30 = vsel %vm1191_vm12, %v1187_v25, inf  ;;  %vm1149_vm13 = vcmp.eq.f32.partialorder %v2269_v21, %v2471_v28 }
 0x3f4   : > { %1193 = vmin.xlane.f32.xlu1 %v1192_v30  ;;  %v1150_v8 = vsel %vm1149_vm13, %v1145_v9, inf }
 0x3f5   : > { %v2478_v35 = vpop.xlane.xlu1 %1161  ;;  %1151 = vmin.xlane.f32.xlu0 %v1150_v8  ;;  %v1084_v8 = vcvt.f32.s32 %v2428_v59 }
 0x3f6   : > { %vm1163_vm14 = vcmp.eq.f32.partialorder %v2289_v50, %v2478_v35  ;;  %v2483_v37 = vpop.xlane.xlu0 %1203 }
 0x3f7   : > { %v1164_v55 = vsel %vm1163_vm14, %v1159_v10, inf  ;;  %vm1205_vm15 = vcmp.eq.f32.partialorder %v2300_v7, %v2483_v37 }
 0x3f8   : > { %1165 = vmin.xlane.f32.xlu1 %v1164_v55  ;;  %v1206_v21 = vsel %vm1205_vm15, %v1201_v46, inf  ;;  %v1042_v55 = vcvt.f32.s32 %v2430_v14  ;;  %v1056_v46 = vcvt.f32.s32 %v2438_v3  ;;  %v1196_v14 = vcvt.f32.s32 %v2468_v32 }
 0x3f9   : > { %v2488_v47 = vpop.xlane.xlu1 %1217  ;;  %1207 = vmin.xlane.f32.xlu0 %v1206_v21  ;;  %v1126_v21 = vcvt.f32.s32 %v2441_v49  ;;  %v1154_v49 = vcvt.f32.s32 %v2471_v28 }
 0x3fa   : > { %vm1219_vm0 = vcmp.eq.f32.partialorder %v2313_v45, %v2488_v47  ;;  %v2493_v50 = vpop.xlane.xlu0 %1231 }
 0x3fb   : > { %v1220_v16 = vsel %vm1219_vm0, %v1215_v17, inf  ;;  %vm1233_vm2 = vcmp.eq.f32.partialorder %v2323_v53, %v2493_v50  ;;  %v1098_v17 = vcvt.f32.s32 %v2451_v62 }
 0x3fc   : > { %1221 = vmin.xlane.f32.xlu1 %v1220_v16  ;;  %v1234_v7 = vsel %vm1233_vm2, %v1229_v24, inf  ;;  %v1112_v16 = vcvt.f32.s32 %v2458_v18  ;;  %v1182_v24 = vcvt.f32.s32 %v2461_v22  ;;  %v1210_v18 = vcvt.f32.s32 %v2483_v37 }
 0x3fd   : > { %v2497_v20 = vpop.xlane.xlu1 %1245  ;;  %1235 = vmin.xlane.f32.xlu0 %v1234_v7  ;;  %v2521_v7 = vshll.u32 %v1084_v8, 16  ;;  %v1224_v22 = vcvt.f32.s32 %v2488_v47  ;;  %v2537_v28 = vshll.u32 %v1098_v17, 16  ;;  %v1238_v37 = vcvt.f32.s32 %v2493_v50 }
 0x3fe   : > { %vm1247_vm3 = vcmp.eq.f32.partialorder %v2330_v36, %v2497_v20  ;;  %v936_v6 = vpop.xlane.xlu0 %935  ;;  %v1070_v36 = vcvt.f32.s32 %v2422_v4  ;;  %v1140_v4 = vcvt.f32.s32 %v2448_v0  ;;  %v1168_v0 = vcvt.f32.s32 %v2478_v35 }
 0x3ff   : > { %v1248_v54 = vsel %vm1247_vm3, %v1243_v60, inf  ;;  %1793 = vrcp.f32 %v936_v6  ;;  %v2557_v17 = vshll.u32 %v1224_v22, 16 }
 0x400   : > { %1249 = vmin.xlane.f32.xlu1 %v1248_v54  ;;  %1795 = vlog2.f32 %v936_v6  ;;  %v2509_v40 = vshll.u32 %v1070_v36, 16  ;;  %v2527_v54 = vshll.u32 %v1042_v55, 16  ;;  %v2531_v6 = vshll.u32 %v1056_v46, 16 }
 0x401   : > { %v938_v45 = vpop.xlane.xlu1 %937  ;;  %v2548_v36 = vshll.u32 %v1168_v0, 16  ;;  %2961 = vst [vmem:[#allocation29_spill] sm:$0xff] %v2557_v17 }
 0x402   : > { %v940_v26 = vpop.xlane.xlu0 %939  ;;  %1797 = vrcp.f32 %v938_v45 }
 0x403   : > { %1799 = vlog2.f32 %v938_v45  ;;  %v2533_v45 = vshll.u32 %v1126_v21, 16 }
 0x404   : > { %1801 = vrcp.f32 %v940_v26 }
 0x405   : > { %v942_v51 = vpop.xlane.xlu1 %941  ;;  %1803 = vlog2.f32 %v940_v26  ;;  %v2535_v26 = vshll.u32 %v1140_v4, 16  ;;  %v2555_v4 = vshll.u32 %v1210_v18, 16 }
 0x406   : > { %v944_v23 = vpop.xlane.xlu0 %943  ;;  %1805 = vrcp.f32 %v942_v51 }
 0x407   : > { %1807 = vlog2.f32 %v942_v51  ;;  %v2539_v51 = vshll.u32 %v1112_v16, 16 }
 0x408   : > { %1809 = vrcp.f32 %v944_v23 }
 0x409   : > { %v946_v25 = vpop.xlane.xlu1 %945  ;;  %1811 = vlog2.f32 %v944_v23  ;;  %v1794_v10 = vpop.eup %1793  ;;  %v2541_v23 = vshll.u32 %v1182_v24, 16 }
 0x40a   : > { %v948_v31 = vpop.xlane.xlu0 %947  ;;  %1813 = vrcp.f32 %v946_v25  ;;  %v1796_v58 = vpop.eup %1795  ;;  %v983_v46 = vmul.f32 %v1794_v10, %v2338_v15  ;;  %v2567_v10 = vshll.u32 %v1238_v37, 16  ;;  %v2968_v37 = vld [vmem:[#allocation19_spill] sm:$0xff] }
 0x40b   : > { %1815 = vlog2.f32 %v946_v25  ;;  %v2543_v25 = vshll.u32 %v1196_v14, 16  ;;  %v2552_v55 = vmul.f32 0.6931472, %v1796_v58 }
 0x40c   : > { %v1798_v59 = vpop.eup %1797  ;;  %1817 = vrcp.f32 %v948_v31  ;;  %2962 = vst [vmem:[#allocation30_spill] sm:$0xff] %v2567_v10 }
 0x40d   : > { %v950_v9 = vpop.xlane.xlu1 %949  ;;  %v1800_v3 = vpop.eup %1799  ;;  %1819 = vlog2.f32 %v948_v31  ;;  %v2546_v31 = vshll.u32 %v1154_v49, 16  ;;  %v984_v16 = vmul.f32 %v1798_v59, %v2346_v33 }
 0x40e   : > { %v2501_v53 = vpop.xlane.xlu0 %951  ;;  %v1802_v60 = vpop.eup %1801  ;;  %1821 = vrcp.f32 %v950_v9  ;;  %v2563_v14 = vmul.f32 0.6931472, %v1800_v3 }
 0x40f   : > { %v1804_v32 = vpop.eup %1803  ;;  %1823 = vlog2.f32 %v950_v9  ;;  %v985_v58 = vmul.f32 %v1802_v60, %v2354_v38  ;;  %v2579_v38 = vsel %vm838_vm1, %v983_v46, %v2015_v34  ;;  %v2963_v60 = vld [vmem:[#allocation4_spill] sm:$0xff]  ;;  %v2964_v34 = vld [vmem:[#allocation17_spill] sm:$0xff] }
 0x410   : > { %v1806_v35 = vpop.eup %1805  ;;  %1825 = vrcp.f32 %v2501_v53  ;;  %v1276_v49 = vmul.f32 0.6931472, %v1804_v32 }
 0x411   : > { %v2503_v30 = vpop.xlane.xlu1 %957  ;;  %v1808_v47 = vpop.eup %1807  ;;  %1827 = vlog2.f32 %v2501_v53  ;;  %v986_v9 = vmul.f32 %v1806_v35, %v2362_v19  ;;  %v2587_v19 = vsel %vm838_vm1, %v984_v16, %v2963_v60  ;;  %v2967_v60 = vld [vmem:[#allocation3_spill] sm:$0xff] }
 0x412   : > { %v2506_v63 = vpop.xlane.xlu0 %955  ;;  %v1810_v21 = vpop.eup %1809  ;;  %1829 = vrcp.f32 %v2503_v30  ;;  %v2572_v59 = vmul.f32 0.6931472, %v1808_v47  ;;  %v2965_v47 = vld [vmem:[#allocation2_spill] sm:$0xff] }
 0x413   : > { %v1812_v50 = vpop.eup %1811  ;;  %1831 = vlog2.f32 %v2503_v30  ;;  %v987_v18 = vmul.f32 %v1810_v21, %v2369_v57  ;;  %v1369_v30 = vsel %vm838_vm1, %v985_v58, %v2965_v47  ;;  %v2966_v57 = vld [vmem:[#allocation18_spill] sm:$0xff]  ;;  %v1370_v3 = vsel %vm838_vm1, %v986_v9, %v2967_v60 }
 0x414   : > { %v1814_v15 = vpop.eup %1813  ;;  %v2582_v53 = vmul.f32 0.6931472, %v1812_v50  ;;  %1833 = vrcp.f32 %v2506_v63  ;;  %v1305_v21 = vsub.f32 %v2966_v57, %v1276_v49  ;;  %v1306_v10 = vsub.f32 %v2968_v37, %v2572_v59  ;;  %v2971_v57 = vld [vmem:[#allocation5_spill] sm:$0xff] }
 0x415   : > { %v2516_v56 = vpop.xlane.xlu1 %953  ;;  %v1816_v33 = vpop.eup %1815  ;;  %v988_v46 = vmul.f32 %v1814_v15, %v2376_v11  ;;  %1835 = vlog2.f32 %v2506_v63  ;;  %v2969_v15 = vld [vmem:[#allocation7_spill] sm:$0xff] }
 0x416   : > { %v2525_v62 = vpop.xlane.xlu0 %963  ;;  %v1818_v0 = vpop.eup %1817  ;;  %1837 = vrcp.f32 %v2516_v56  ;;  %v2607_v17 = vmul.f32 0.6931472, %v1816_v33  ;;  %v1307_v63 = vsub.f32 %v2293_v41, %v2582_v53  ;;  %v2617_v49 = vsel %vm838_vm1, %v987_v18, %v2969_v15  ;;  %v2976_v41 = vld [vmem:[#allocation10_spill] sm:$0xff] }
 0x417   : > { %v1820_v22 = vpop.eup %1819  ;;  %v989_v58 = vmul.f32 %v1818_v0, %v2384_v13  ;;  %1839 = vlog2.f32 %v2516_v56  ;;  %v2970_v0 = vld [vmem:[#allocation8_spill] sm:$0xff] }
 0x418   : > { %v1822_v50 = vpop.eup %1821  ;;  %1841 = vrcp.f32 %v2525_v62  ;;  %v2620_v33 = vmul.f32 0.6931472, %v1820_v22  ;;  %v1308_v22 = vsub.f32 %v2306_v43, %v2607_v17 }
 0x419   : > { %v2550_v8 = vpop.xlane.xlu1 %965  ;;  %v990_v13 = vmul.f32 %v1822_v50, %v2392_v48  ;;  %v1824_v56 = vpop.eup %1823  ;;  %1843 = vlog2.f32 %v2525_v62  ;;  %v1373_v48 = vsel %vm838_vm1, %v989_v58, %v2971_v57 }
 0x41a   : > { %v2561_v24 = vpop.xlane.xlu0 %959  ;;  %v1826_v18 = vpop.eup %1825  ;;  %1845 = vrcp.f32 %v2550_v8  ;;  %v1309_v15 = vsub.f32 %v2318_v1, %v2620_v33  ;;  %v1286_v58 = vmul.f32 0.6931472, %v1824_v56 }
 0x41b   : > { %v1828_v50 = vpop.eup %1827  ;;  %1847 = vlog2.f32 %v2550_v8  ;;  %v991_v1 = vmul.f32 %v1826_v18, %v2396_v42 }
 0x41c   : > { %v1830_v62 = vpop.eup %1829  ;;  %1849 = vlog2.f32 %v2561_v24 }
 0x41d   : > { %v2591_v32 = vpop.xlane.xlu1 %961 }
 0x41e   : > { %1851 = vlog2.f32 %v2591_v32 }
 0x41f   : > { %1853 = vrcp.f32 %v2561_v24 }
 0x420   : > { %1855 = vrcp.f32 %v2591_v32 }
 0x46d   : > { %v1068_v35 = vpop.xlane.xlu0 %1067 }
 0x46e   : > { %v1069_v16 = vcvt.f32.s32 %v1068_v35 }
 0x470   : > { %v1072_v11 = vadd.s32 %v2509_v40, %v1069_v16  ;;  %v2626_v40 = vsel %vm838_vm1, %v988_v46, %v2970_v0 }
 0x471   : > { %v1082_v9 = vpop.xlane.xlu1 %1081  ;;  %v1040_v59 = vpop.xlane.xlu0 %1039 }
 0x472   : > { %v1386_v35 = vcvt.s32.f32 %v1072_v11  ;;  %v1083_v37 = vcvt.f32.s32 %v1082_v9  ;;  %v1041_v47 = vcvt.f32.s32 %v1040_v59  ;;  %vm1257_vm5 = vcmp.eq.s32.totalorder %v2007_v29, %v1072_v11  ;;  %v2972_v9 = vld [vmem:[#allocation6_spill] sm:$0xff] }
 0x473   : > { %v1321_v16 = vsel %vm1257_vm5, %v1305_v21, 0.0  ;;  %v2648_v59 = vsel %vm838_vm1, %v990_v13, %v2972_v9  ;;  %v2973_v13 = vsub.f32 %v2236_v5, %v2552_v55  ;;  %v1310_v5 = vsub.f32 %v2327_v39, %v1286_v58 }
 0x474   : > { %v1086_v46 = vadd.s32 %v2521_v7, %v1083_v37  ;;  %v1044_v60 = vadd.s32 %v2527_v54, %v1041_v47  ;;  %1339 = vadd.xlane.f32.xlu0 %v1321_v16  ;;  %v2640_v11 = vsel %vm1383_vm4, %v1386_v35, %v1369_v30  ;;  %v1832_v7 = vpop.eup %1831  ;;  %v2671_v55 = vmul.f32 0.6931472, %v1828_v50 }
 0x475   : > { %v1054_v21 = vpop.xlane.xlu1 %1053  ;;  %v1834_v30 = vpop.eup %1833 }
 0x476   : > { %v1387_v54 = vcvt.s32.f32 %v1086_v46  ;;  %v1384_v0 = vcvt.s32.f32 %v1044_v60  ;;  %v1055_v37 = vcvt.f32.s32 %v1054_v21  ;;  %v1124_v47 = vpop.xlane.xlu0 %1123  ;;  %vm1258_vm6 = vcmp.eq.s32.totalorder %v2007_v29, %v1086_v46  ;;  %v1836_v33 = vpop.eup %1835 }
 0x477   : > { %v1125_v35 = vcvt.f32.s32 %v1124_v47  ;;  %v1322_v8 = vsel %vm1258_vm6, %v1306_v10, 0.0  ;;  %vm1255_vm7 = vcmp.eq.s32.totalorder %v2007_v29, %v1044_v60  ;;  %v2666_v46 = vpop.eup %1837 }
 0x478   : > { %v1058_v56 = vadd.s32 %v2531_v6, %v1055_v37  ;;  %1341 = vadd.xlane.f32.xlu1 %v1322_v8  ;;  %v1319_v16 = vsel %vm1255_vm7, %v2973_v13, 0.0  ;;  %v2659_v57 = vsel %vm1383_vm4, %v1387_v54, %v1370_v3  ;;  %v2664_v10 = vsel %vm1383_vm4, %v1384_v0, %v2579_v38  ;;  %v2673_v18 = vpop.eup %1839 }
 0x479   : > { %v1128_v42 = vadd.s32 %v2533_v45, %v1125_v35  ;;  %1335 = vadd.xlane.f32.xlu0 %v1319_v16  ;;  %v1138_v6 = vpop.xlane.xlu1 %1137  ;;  %v994_v38 = vmul.f32 %v1830_v62, %v2400_v44  ;;  %v2677_v9 = vpop.eup %1841  ;;  %v2974_v45 = vsub.f32 %v2964_v34, %v2563_v14  ;;  %v1294_v14 = vmul.f32 0.6931472, %v1832_v7  ;;  %v2975_v35 = vld [vmem:[#allocation11_spill] sm:$0xff] }
 0x47a   : > { %v1385_v3 = vcvt.s32.f32 %v1058_v56  ;;  %v1139_v60 = vcvt.f32.s32 %v1138_v6  ;;  %v1096_v21 = vpop.xlane.xlu0 %1095  ;;  %vm1256_vm8 = vcmp.eq.s32.totalorder %v2007_v29, %v1058_v56  ;;  %v2690_v62 = vpop.eup %1843  ;;  %v1290_v17 = vmul.f32 0.6931472, %v2673_v18 }
 0x47b   : > { %v1390_v54 = vcvt.s32.f32 %v1128_v42  ;;  %v1097_v0 = vcvt.f32.s32 %v1096_v21  ;;  %v1320_v37 = vsel %vm1256_vm8, %v2974_v45, 0.0  ;;  %vm1261_vm9 = vcmp.eq.s32.totalorder %v2007_v29, %v1128_v42 }
 0x47c   : > { %v1142_v39 = vadd.s32 %v2535_v26, %v1139_v60  ;;  %1337 = vadd.xlane.f32.xlu1 %v1320_v37  ;;  %v1325_v50 = vsel %vm1261_vm9, %v1309_v15, 0.0  ;;  %v2688_v44 = vsel %vm1383_vm4, %v1385_v3, %v2587_v19  ;;  %v2700_v26 = vsel %vm838_vm1, %v991_v1, %v2975_v35  ;;  %v2702_v15 = vpop.eup %1845 }
 0x47d   : > { %v1100_v58 = vadd.s32 %v2537_v28, %v1097_v0  ;;  %v1110_v47 = vpop.xlane.xlu1 %1109  ;;  %1347 = vadd.xlane.f32.xlu0 %v1325_v50  ;;  %v2695_v34 = vsel %vm1383_vm4, %v1390_v54, %v1373_v48  ;;  %v1292_v28 = vmul.f32 0.6931472, %v1836_v33  ;;  %v2705_v13 = vpop.eup %1847  ;;  %v993_v33 = vmul.f32 %v1834_v30, %v2403_v12  ;;  %v2977_v0 = vld [vmem:[#allocation9_spill] sm:$0xff] }
 0x47e   : > { %v1391_v19 = vcvt.s32.f32 %v1142_v39  ;;  %v1111_v8 = vcvt.f32.s32 %v1110_v47  ;;  %v1180_v56 = vpop.xlane.xlu0 %1179  ;;  %vm1262_vm10 = vcmp.eq.s32.totalorder %v2007_v29, %v1142_v39  ;;  %v1378_v53 = vsel %vm838_vm1, %v994_v38, %v2976_v41  ;;  %v2981_v41 = vld [vmem:[#allocation29_spill] sm:$0xff] }
 0x47f   : > { %v1388_v7 = vcvt.s32.f32 %v1100_v58  ;;  %v1181_v16 = vcvt.f32.s32 %v1180_v56  ;;  %v1326_v42 = vsel %vm1262_vm10, %v1310_v5, 0.0  ;;  %vm1259_vm11 = vcmp.eq.s32.totalorder %v2007_v29, %v1100_v58 }
 0x480   : > { %v1114_v48 = vadd.s32 %v2539_v51, %v1111_v8  ;;  %1349 = vadd.xlane.f32.xlu1 %v1326_v42  ;;  %v1323_v1 = vsel %vm1259_vm11, %v1307_v63, 0.0  ;;  %v2715_v6 = vsel %vm1383_vm4, %v1391_v19, %v2648_v59  ;;  %v1311_v5 = vsub.f32 %v2335_v27, %v2671_v55 }
 0x481   : > { %v1184_v3 = vadd.s32 %v2541_v23, %v1181_v16  ;;  %v1194_v60 = vpop.xlane.xlu1 %1193  ;;  %1343 = vadd.xlane.f32.xlu0 %v1323_v1  ;;  %v2724_v51 = vsel %vm1383_vm4, %v1388_v7, %v2617_v49  ;;  %v1313_v12 = vsub.f32 %v2350_v2, %v1292_v28  ;;  %v1850_v23 = vpop.eup %1849  ;;  %v1377_v2 = vsel %vm838_vm1, %v993_v33, %v2977_v0 }
 0x482   : > { %v1389_v63 = vcvt.s32.f32 %v1114_v48  ;;  %v1195_v59 = vcvt.f32.s32 %v1194_v60  ;;  %v1152_v21 = vpop.xlane.xlu0 %1151  ;;  %vm1260_vm12 = vcmp.eq.s32.totalorder %v2007_v29, %v1114_v48  ;;  %v1314_v43 = vsub.f32 %v2343_v52, %v1294_v14  ;;  %v2980_v60 = vld [vmem:[#allocation12_spill] sm:$0xff] }
 0x483   : > { %v1394_v30 = vcvt.s32.f32 %v1184_v3  ;;  %v1153_v54 = vcvt.f32.s32 %v1152_v21  ;;  %v1324_v27 = vsel %vm1260_vm12, %v1308_v22, 0.0  ;;  %vm1265_vm13 = vcmp.eq.s32.totalorder %v2007_v29, %v1184_v3  ;;  %v1852_v22 = vpop.eup %1851 }
 0x484   : > { %v1198_v49 = vadd.s32 %v2543_v25, %v1195_v59  ;;  %1345 = vadd.xlane.f32.xlu1 %v1324_v27  ;;  %v1329_v55 = vsel %vm1265_vm13, %v1313_v12, 0.0  ;;  %v2739_v38 = vsel %vm1383_vm4, %v1389_v63, %v2626_v40  ;;  %v992_v50 = vmul.f32 %v2666_v46, %v2406_v61  ;;  %v2978_v61 = vld [vmem:[#allocation20_spill] sm:$0xff]  ;;  %v2984_v27 = vld [vmem:[#allocation30_spill] sm:$0xff] }
 0x485   : > { %v1156_v45 = vadd.s32 %v2546_v31, %v1153_v54  ;;  %v1166_v37 = vpop.xlane.xlu1 %1165  ;;  %1355 = vadd.xlane.f32.xlu0 %v1329_v55  ;;  %v2749_v25 = vsel %vm1383_vm4, %v1394_v30, %v1377_v2  ;;  %v1296_v52 = vmul.f32 0.6931472, %v1850_v23  ;;  %v1252_v8 = vcvt.f32.s32 %v2497_v20  ;;  %v2979_v20 = vld [vmem:[#allocation23_spill] sm:$0xff]  ;;  %v2983_v12 = vld [vmem:[#allocation24_spill] sm:$0xff] }
 0x486   : > { %v1395_v39 = vcvt.s32.f32 %v1198_v49  ;;  %v1167_v40 = vcvt.f32.s32 %v1166_v37  ;;  %vm1266_vm14 = vcmp.eq.s32.totalorder %v2007_v29, %v1198_v49  ;;  %v1208_v31 = vpop.xlane.xlu0 %1207  ;;  %v1312_v46 = vsub.f32 %v2978_v61, %v1290_v17 }
 0x487   : > { %v1392_v58 = vcvt.s32.f32 %v1156_v45  ;;  %v1330_v47 = vsel %vm1266_vm14, %v1314_v43, 0.0  ;;  %vm1263_vm15 = vcmp.eq.s32.totalorder %v2007_v29, %v1156_v45  ;;  %v1209_v14 = vcvt.f32.s32 %v1208_v31  ;;  %v2986_v45 = vld [vmem:[#allocation26_spill] sm:$0xff] }
 0x488   : > { %v1170_v18 = vadd.s32 %v2548_v36, %v1167_v40  ;;  %1357 = vadd.xlane.f32.xlu1 %v1330_v47  ;;  %v1327_v35 = vsel %vm1263_vm15, %v1311_v5, 0.0  ;;  %v2758_v19 = vsel %vm1383_vm4, %v1395_v39, %v1378_v53  ;;  %v1298_v28 = vmul.f32 0.6931472, %v1852_v22  ;;  %v2987_v22 = vld [vmem:[#allocation22_spill] sm:$0xff]  ;;  %v2989_v47 = vld [vmem:[#allocation16_spill] sm:$0xff] }
 0x489   : > { %v1222_v56 = vpop.xlane.xlu1 %1221  ;;  %1351 = vadd.xlane.f32.xlu0 %v1327_v35  ;;  %v2765_v7 = vsel %vm1383_vm4, %v1392_v58, %v2700_v26  ;;  %v2768_v16 = vadd.s32 %v2555_v4, %v1209_v14  ;;  %v1315_v33 = vsub.f32 %v2979_v20, %v1296_v52  ;;  %v1300_v3 = vmul.f32 0.6931472, %v2690_v62  ;;  %v2982_v4 = vld [vmem:[#allocation25_spill] sm:$0xff]  ;;  %v2988_v40 = vld [vmem:[#allocation14_spill] sm:$0xff] }
 0x48a   : > { %v1393_v36 = vcvt.s32.f32 %v1170_v18  ;;  %v1223_v42 = vcvt.f32.s32 %v1222_v56  ;;  %vm1264_vm0 = vcmp.eq.s32.totalorder %v2007_v29, %v1170_v18  ;;  %v1236_v48 = vpop.xlane.xlu0 %1235  ;;  %v1376_v5 = vsel %vm838_vm1, %v992_v50, %v2980_v60  ;;  %v2990_v60 = vld [vmem:[#allocation27_spill] sm:$0xff] }
 0x48b   : > { %v1328_v1 = vsel %vm1264_vm0, %v1312_v46, 0.0  ;;  %v1237_v53 = vcvt.f32.s32 %v1236_v48  ;;  %vm1267_vm2 = vcmp.eq.s32.totalorder %v2007_v29, %v2768_v16  ;;  %v997_v63 = vmul.f32 %v2677_v9, %v2982_v4  ;;  %v2985_v9 = vld [vmem:[#allocation21_spill] sm:$0xff] }
 0x48c   : > { %v2777_v26 = vadd.s32 %v2981_v41, %v1223_v42  ;;  %1353 = vadd.xlane.f32.xlu1 %v1328_v1  ;;  %v1331_v21 = vsel %vm1267_vm2, %v1315_v33, 0.0  ;;  %v1316_v23 = vsub.f32 %v2983_v12, %v1298_v28  ;;  %v1302_v62 = vmul.f32 0.6931472, %v2705_v13  ;;  %v1854_v1 = vpop.eup %1853 }
 0x48d   : > { %v1250_v59 = vpop.xlane.xlu1 %1249  ;;  %v2787_v30 = vsel %vm1383_vm4, %v1393_v36, %v1376_v5  ;;  %v1253_v54 = vshll.u32 %v1252_v8, 16  ;;  %v1240_v49 = vadd.s32 %v2984_v27, %v1237_v53  ;;  %1359 = vadd.xlane.f32.xlu0 %v1331_v21  ;;  %v1317_v2 = vsub.f32 %v2985_v9, %v1300_v3  ;;  %v1856_v20 = vpop.eup %1855 }
 0x48e   : > { %v1251_v55 = vcvt.f32.s32 %v1250_v59  ;;  %vm1268_vm3 = vcmp.eq.s32.totalorder %v2007_v29, %v2777_v26  ;;  %v998_v37 = vmul.f32 %v2702_v15, %v2986_v45  ;;  %v1318_v39 = vsub.f32 %v2987_v22, %v1302_v62  ;;  %v2992_v59 = vld [vmem:[#allocation13_spill] sm:$0xff] }
 0x48f   : > { %v1332_v0 = vsel %vm1268_vm3, %v1316_v23, 0.0  ;;  %v1398_v43 = vcvt.s32.f32 %v1240_v49  ;;  %vm1269_vm5 = vcmp.eq.s32.totalorder %v2007_v29, %v1240_v49  ;;  %v1381_v50 = vsel %vm838_vm1, %v997_v63, %v2988_v40 }
 0x490   : > { %v1254_v13 = vadd.s32 %v1253_v54, %v1251_v55  ;;  %1361 = vadd.xlane.f32.xlu1 %v1332_v0  ;;  %v1333_v17 = vsel %vm1269_vm5, %v1317_v2, 0.0  ;;  %v1382_v52 = vsel %vm838_vm1, %v998_v37, %v2989_v47  ;;  %vm1416_vm7 = vcmp.eq.s32.totalorder %v2007_v29, 127 }
 0x491   : > { %1363 = vadd.xlane.f32.xlu0 %v1333_v17  ;;  %v2803_v15 = vsel %vm1383_vm4, %v1398_v43, %v1381_v50  ;;  %v995_v5 = vmul.f32 %v1854_v1, %v2990_v60  ;;  %v1397_v4 = vcvt.s32.f32 %v2777_v26  ;;  %v2993_v26 = vld [vmem:[#allocation15_spill] sm:$0xff] }
 0x492   : > { %v1399_v58 = vcvt.s32.f32 %v1254_v13  ;;  %vm1270_vm6 = vcmp.eq.s32.totalorder %v2007_v29, %v1254_v13 }
 0x493   : > { %v1334_v31 = vsel %vm1270_vm6, %v1318_v39, 0.0 }
 0x494   : > { %1365 = vadd.xlane.f32.xlu1 %v1334_v31  ;;  %v1415_v18 = vsel %vm1383_vm4, %v1399_v58, %v1382_v52 }
 0x501   : > { %v1340_v14 = vpop.xlane.xlu0 %1339 }
 0x502   : > { %v1419_v35 = vsel %vm1416_vm7, %v1340_v14, %v2640_v11 }
 0x503   : > { %1435 = vst [vmem:[%s2816_s11 + $0x10] sm:$0xff] %v1419_v35 }
 0x505   : > { %v1342_v8 = vpop.xlane.xlu1 %1341 }
 0x506   : > { %v1420_v56 = vsel %vm1416_vm7, %v1342_v8, %v2659_v57  ;;  %v1336_v61 = vpop.xlane.xlu0 %1335 }
 0x507   : > { %1436 = vst [vmem:[%s2816_s11 + $0x18] sm:$0xff] %v1420_v56  ;;  %v1417_v46 = vsel %vm1416_vm7, %v1336_v61, %v2664_v10 }
 0x508   : > { %1433 = vst [vmem:[%s2816_s11] sm:$0xff] %v1417_v46 }
 0x509   : > { %v1338_v28 = vpop.xlane.xlu1 %1337 }
 0x50a   : > { %v1418_v11 = vsel %vm1416_vm7, %v1338_v28, %v2688_v44  ;;  %v1348_v36 = vpop.xlane.xlu0 %1347 }
 0x50b   : > { %1434 = vst [vmem:[%s2816_s11 + $0x8] sm:$0xff] %v1418_v11  ;;  %v1423_v57 = vsel %vm1416_vm7, %v1348_v36, %v2695_v34 }
 0x50c   : > { %1439 = vst [vmem:[%s2816_s11 + $0x30] sm:$0xff] %v1423_v57 }
 0x50d   : > { %v1350_v10 = vpop.xlane.xlu1 %1349 }
 0x50e   : > { %v1424_v24 = vsel %vm1416_vm7, %v1350_v10, %v2715_v6  ;;  %v1344_v42 = vpop.xlane.xlu0 %1343 }
 0x50f   : > { %1440 = vst [vmem:[%s2816_s11 + $0x38] sm:$0xff] %v1424_v24  ;;  %v1421_v44 = vsel %vm1416_vm7, %v1344_v42, %v2724_v51 }
 0x510   : > { %1437 = vst [vmem:[%s2816_s11 + $0x20] sm:$0xff] %v1421_v44 }
 0x511   : > { %v1346_v32 = vpop.xlane.xlu1 %1345 }
 0x512   : > { %v1422_v34 = vsel %vm1416_vm7, %v1346_v32, %v2739_v38  ;;  %v1356_v48 = vpop.xlane.xlu0 %1355  ;;  %v1396_v38 = vcvt.s32.f32 %v2768_v16  ;;  %v1379_v16 = vsel %vm838_vm1, %v995_v5, %v2992_v59 }
 0x513   : > { %1438 = vst [vmem:[%s2816_s11 + $0x28] sm:$0xff] %v1422_v34  ;;  %v1427_v6 = vsel %vm1416_vm7, %v1356_v48, %v2749_v25  ;;  %v2991_v25 = vld [vmem:[#allocation28_spill] sm:$0xff] }
 0x514   : > { %1443 = vst [vmem:[%s2816_s11 + $0x50] sm:$0xff] %v1427_v6  ;;  %v996_v53 = vmul.f32 %v1856_v20, %v2991_v25 }
 0x515   : > { %v1358_v33 = vpop.xlane.xlu1 %1357 }
 0x516   : > { %v1428_v51 = vsel %vm1416_vm7, %v1358_v33, %v2758_v19  ;;  %v1352_v3 = vpop.xlane.xlu0 %1351  ;;  %v1380_v23 = vsel %vm838_vm1, %v996_v53, %v2993_v26 }
 0x517   : > { %1444 = vst [vmem:[%s2816_s11 + $0x58] sm:$0xff] %v1428_v51  ;;  %v1425_v41 = vsel %vm1416_vm7, %v1352_v3, %v2765_v7  ;;  %v1412_v7 = vsel %vm1383_vm4, %v1396_v38, %v1379_v16  ;;  %v1413_v62 = vsel %vm1383_vm4, %v1397_v4, %v1380_v23 }
 0x518   : > { %1441 = vst [vmem:[%s2816_s11 + $0x40] sm:$0xff] %v1425_v41 }
 0x519   : > { %v1354_v63 = vpop.xlane.xlu1 %1353 }
 0x51a   : > { %v1426_v19 = vsel %vm1416_vm7, %v1354_v63, %v2787_v30  ;;  %v1360_v21 = vpop.xlane.xlu0 %1359 }
 0x51b   : > { %1442 = vst [vmem:[%s2816_s11 + $0x48] sm:$0xff] %v1426_v19  ;;  %v1429_v12 = vsel %vm1416_vm7, %v1360_v21, %v1412_v7 }
 0x51c   : > { %1445 = vst [vmem:[%s2816_s11 + $0x60] sm:$0xff] %v1429_v12 }
 0x51d   : > { %v1362_v30 = vpop.xlane.xlu1 %1361 }
 0x51e   : > { %v1430_v54 = vsel %vm1416_vm7, %v1362_v30, %v1413_v62  ;;  %v1364_v27 = vpop.xlane.xlu0 %1363 }
 0x51f   : > { %1446 = vst [vmem:[%s2816_s11 + $0x68] sm:$0xff] %v1430_v54  ;;  %v1431_v49 = vsel %vm1416_vm7, %v1364_v27, %v2803_v15 }
 0x520   : > { %1447 = vst [vmem:[%s2816_s11 + $0x70] sm:$0xff] %v1431_v49 }
 0x521   : > { %v1366_v55 = vpop.xlane.xlu1 %1365 }
 0x522   : > { %v1432_v0 = vsel %vm1416_vm7, %v1366_v55, %v1415_v18 }
 0x523   : > { %1448 = vst [vmem:[%s2816_s11 + $0x78] sm:$0xff] %v1432_v0 }
 0x524 PF: > { %s17_s24 = sadd.s32 1, %s1863_s24  }
 0x525   : > { %p14_p4 = scmp.ge.s32.totalorder %s17_s24, 4  }
 0x527   :  { %16 = sbr.rel (!%p14_p4) target bundleno = 1 (0x1), region = 78 }

</bundles_post_ra>
